<compile_context>
chip_gen: v5e
topology: v5e:2x2
jax: 0.10.0
libtpu: 0.0.40
codegen_flags: <defaults>
</compile_context>

<pallas_src>
import math

import jax
import jax.numpy as jnp
from jax import lax
from jax.experimental import pallas as pl
from jax.experimental.pallas import tpu as pltpu

# ---- model sizes (small, consistent with layer.size == D) -------------------
B, S, D = 2, 8, 32        # batch, sequence, model dim
H = 4                     # attention heads
DH = D // H               # head dim
DFF = 64                  # feed-forward hidden dim
N_LAYERS = 2              # nn.ModuleList length (PyTorch default was 6)
EPS = 1e-5                # nn.LayerNorm default eps

F32 = jnp.float32
BF16 = jnp.bfloat16


def _layernorm(v, g, b):
    mu = jnp.mean(v, axis=-1, keepdims=True)
    var = jnp.mean((v - mu) ** 2, axis=-1, keepdims=True)
    return (v - mu) * lax.rsqrt(var + EPS) * g + b


# ---------------------------------------------------------------------------
# fused Pallas kernel: one batch element per grid step, all layers + final LN
# ---------------------------------------------------------------------------
def encoder_kernel(x_ref, mask_ref,
                   ln1g_ref, ln1b_ref, wqkv_ref, bqkv_ref, wo_ref, bo_ref,
                   ln2g_ref, ln2b_ref, w1_ref, b1_ref, w2_ref, b2_ref,
                   lng_ref, lnb_ref, o_ref):
    x = x_ref[...]                                   # (S, D) f32, one batch elem

    # Additive attention bias recomputed on the VPU (no dense bias DMA) and
    # hoisted out of the layer loop.  masked_fill(mask==0, -1e9) semantics:
    # adding -1e9 and replacing with -1e9 both underflow to 0 after softmax.
    bias = jnp.where(mask_ref[...] == 0.0, F32(-1e9), F32(0.0))   # (S, S)
    bias = jnp.broadcast_to(bias[None], (H, S, S))   # materialize once, not per layer

    for l in range(N_LAYERS):                        # static unroll over layers
        # ---- sublayer 1: pre-norm multi-head self-attention + residual -----
        xn = _layernorm(x, ln1g_ref[l], ln1b_ref[l])                 # (S, D) f32
        xn16 = xn.astype(BF16)                                       # cast once
        # Fused QKV projection as one matched-batch-dim einsum (Mosaic-safe
        # batched dot).  1/sqrt(DH) is folded into the Q weights/bias.
        xg = jnp.broadcast_to(xn16[None], (3 * H, S, D))             # (3H, S, D)
        qkv = jnp.einsum('gsd,gdf->gsf', xg, wqkv_ref[l],
                         preferred_element_type=F32) + bqkv_ref[l]   # (3H, S, DH)
        qkv16 = qkv.astype(BF16)                                     # cast once
        q = qkv16[0:H]           # (H, S, DH) -- free leading-axis views,
        k = qkv16[H:2 * H]       # no sub-128-lane slicing / relayout
        v = qkv16[2 * H:]

        s = jnp.einsum('hqd,hkd->hqk', q, k,
                       preferred_element_type=F32) + bias            # (H, S, S)
        s = s - jnp.max(s, axis=-1, keepdims=True)
        p = jnp.exp(s)
        # approx reciprocal (EUP): rows sum to 1 within ~2^-12 -- inference only.
        p = p * pl.reciprocal(jnp.sum(p, axis=-1, keepdims=True), approx=True)
        ctx = jnp.einsum('hqk,hkd->hqd', p.astype(BF16), v,
                         preferred_element_type=F32)                 # (H, S, DH)
        # Output projection accumulated over heads (vectorized leading-axis sum).
        proj = jnp.einsum('hsd,hdo->hso', ctx.astype(BF16), wo_ref[l],
                          preferred_element_type=F32)                # (H, S, D)
        x = x + jnp.sum(proj, axis=0) + bo_ref[l]

        # ---- sublayer 2: pre-norm position-wise FFN + residual --------------
        xn2 = _layernorm(x, ln2g_ref[l], ln2b_ref[l])
        hid = jnp.dot(xn2.astype(BF16), w1_ref[l],
                      preferred_element_type=F32) + b1_ref[l]
        hid = jnp.maximum(hid, 0.0)
        ff = jnp.dot(hid.astype(BF16), w2_ref[l],
                     preferred_element_type=F32) + b2_ref[l]
        x = x + ff

    # final LayerNorm (Encoder.layernorm)
    o_ref[...] = _layernorm(x, lng_ref[...], lnb_ref[...]).astype(o_ref.dtype)


# ---------------------------------------------------------------------------
# wrapper
# ---------------------------------------------------------------------------
def encoder_forward(x, mask, packed_params):
    """Whole Encoder forward (all layers + final LN), grid over batch."""

    def _resident(arr):
        # Full-array VMEM block, same block for every grid step (weights stay
        # resident; fetched once per core).
        return pl.BlockSpec(arr.shape, lambda b, _n=arr.ndim: (0,) * _n)

    in_specs = (
        [pl.BlockSpec((None, S, D), lambda b: (b, 0, 0)),    # x: one batch elem
         pl.BlockSpec((None, S, S), lambda b: (b, 0, 0))]    # mask: one batch elem
        + [_resident(p) for p in packed_params])
    out_spec = pl.BlockSpec((None, S, D), lambda b: (b, 0, 0))

    return pl.pallas_call(
        encoder_kernel,
        out_shape=jax.ShapeDtypeStruct((B, S, D), F32),
        grid=(B,),
        in_specs=in_specs,
        out_specs=out_spec,
        compiler_params=pltpu.CompilerParams(
            # batch axis is independent -> shard across the 2 TCs on v7x
            dimension_semantics=("parallel",)),
    )(x, mask, *packed_params)


# ---------------------------------------------------------------------------
# deterministic parameter init (PyTorch-layout) + kernel-layout packing
# ---------------------------------------------------------------------------
def init_params(key):
    def nrm(k, shape, s):
        return s * jax.random.normal(k, shape, F32)

    layers = []
    for _ in range(N_LAYERS):
        key, *ks = jax.random.split(key, 17)
        layers.append(dict(
            ln1_g=1.0 + nrm(ks[0], (D,), 0.1), ln1_b=nrm(ks[1], (D,), 0.1),
            wq=nrm(ks[2], (D, D), 0.05), bq=nrm(ks[3], (D,), 0.02),
            wk=nrm(ks[4], (D, D), 0.05), bk=nrm(ks[5], (D,), 0.02),
            wv=nrm(ks[6], (D, D), 0.05), bv=nrm(ks[7], (D,), 0.02),
            wo=nrm(ks[8], (D, D), 0.05), bo=nrm(ks[9], (D,), 0.02),
            ln2_g=1.0 + nrm(ks[10], (D,), 0.1), ln2_b=nrm(ks[11], (D,), 0.1),
            w1=nrm(ks[12], (D, DFF), 0.05), b1=nrm(ks[13], (DFF,), 0.02),
            w2=nrm(ks[14], (DFF, D), 0.05), b2=nrm(ks[15], (D,), 0.02),
        ))
    key, k1, k2 = jax.random.split(key, 3)
    lng = 1.0 + 0.1 * jax.random.normal(k1, (D,), F32)
    lnb = 0.1 * jax.random.normal(k2, (D,), F32)
    return layers, lng, lnb


def pack_params(layers, lng, lnb):
    """Reorganize parameters for the kernel:
       * fused QKV weights with a leading (3*H) batch axis: (3H, D, DH), so
         q/k/v come out head-batched and are split on the leading axis,
       * 1/sqrt(DH) softmax scale folded into the Q weights / bias,
       * wo reshaped head-batched (H, DH, D),
       * matmul weights pre-cast to bf16 (f32 accumulation in the kernel),
       * everything stacked along a leading layer axis (static unroll).
    """
    scale = 1.0 / math.sqrt(DH)

    def heads_w(w):            # (D, H*DH) head-major columns -> (H, D, DH)
        return jnp.transpose(w.reshape(D, H, DH), (1, 0, 2))

    def heads_b(b):            # (H*DH,) -> (H, 1, DH)
        return b.reshape(H, DH)[:, None, :]

    ln1g, ln1b, ln2g, ln2b = [], [], [], []
    wqkv, bqkv, wo, bo = [], [], [], []
    w1, b1, w2, b2 = [], [], [], []
    for p in layers:
        ln1g.append(p['ln1_g'][None]); ln1b.append(p['ln1_b'][None])
        ln2g.append(p['ln2_g'][None]); ln2b.append(p['ln2_b'][None])
        wqkv.append(jnp.concatenate(
            [heads_w(p['wq'] * scale), heads_w(p['wk']), heads_w(p['wv'])],
            axis=0))                                   # (3H, D, DH)
        bqkv.append(jnp.concatenate(
            [heads_b(p['bq'] * scale), heads_b(p['bk']), heads_b(p['bv'])],
            axis=0))                                   # (3H, 1, DH)
        wo.append(p['wo'].reshape(H, DH, D))           # (H, DH, D)
        bo.append(p['bo'][None])
        w1.append(p['w1']); b1.append(p['b1'][None])
        w2.append(p['w2']); b2.append(p['b2'][None])

    stack = jnp.stack
    return (
        stack(ln1g), stack(ln1b),
        stack(wqkv).astype(BF16), stack(bqkv),
        stack(wo).astype(BF16), stack(bo),
        stack(ln2g), stack(ln2b),
        stack(w1).astype(BF16), stack(b1),
        stack(w2).astype(BF16), stack(b2),
        lng[None], lnb[None],
    )


# ---------------------------------------------------------------------------
# pure-JAX reference (PyTorch semantics, f32 HIGHEST) for a sanity check
# ---------------------------------------------------------------------------
def ref_forward(x, mask, layers, lng, lnb):
    hp = lax.Precision.HIGHEST

    def ln(v, g, b):
        mu = v.mean(-1, keepdims=True)
        var = ((v - mu) ** 2).mean(-1, keepdims=True)
        return (v - mu) / jnp.sqrt(var + EPS) * g + b

    for p in layers:
        xn = ln(x, p['ln1_g'], p['ln1_b'])
        q = jnp.einsum('bsd,de->bse', xn, p['wq'], precision=hp) + p['bq']
        k = jnp.einsum('bsd,de->bse', xn, p['wk'], precision=hp) + p['bk']
        v = jnp.einsum('bsd,de->bse', xn, p['wv'], precision=hp) + p['bv']
        qh = q.reshape(B, S, H, DH)
        kh = k.reshape(B, S, H, DH)
        vh = v.reshape(B, S, H, DH)
        s = jnp.einsum('bqhd,bkhd->bhqk', qh, kh, precision=hp) / math.sqrt(DH)
        s = jnp.where(mask[:, None, :, :] == 0.0, -1e9, s)
        a = jax.nn.softmax(s, axis=-1)
        o = jnp.einsum('bhqk,bkhd->bqhd', a, vh, precision=hp).reshape(B, S, D)
        x = x + jnp.einsum('bsd,de->bse', o, p['wo'], precision=hp) + p['bo']
        xn2 = ln(x, p['ln2_g'], p['ln2_b'])
        hid = jax.nn.relu(
            jnp.einsum('bsd,df->bsf', xn2, p['w1'], precision=hp) + p['b1'])
        x = x + jnp.einsum('bsf,fd->bsd', hid, p['w2'], precision=hp) + p['b2']
    return ln(x, lng, lnb)


if __name__ == "__main__":
    key = jax.random.PRNGKey(0)
    kx, kp = jax.random.split(key)
    x = jax.random.normal(kx, (B, S, D), F32)
    # mask: batch 0 attends everywhere; batch 1 masks out the last 2 keys.
    mask = jnp.ones((B, S, S), F32)
    mask = mask.at[1, :, S - 2:].set(0.0)

    layers, lng, lnb = init_params(kp)
    packed = pack_params(layers, lng, lnb)

    out = encoder_forward(x, mask, packed)
    out = jax.block_until_ready(out)

    ref = ref_forward(x, mask, layers, lng, lnb)
    assert out.shape == (B, S, D)
    assert bool(jnp.all(jnp.isfinite(out)))
    err = float(jnp.max(jnp.abs(out - ref)))
    # bf16 MXU operands + approx reciprocal vs. an f32 HIGHEST-precision ref.
    assert err < 2e-2, f"mismatch vs JAX reference: max abs err = {err}"
    print("KERNEL_OK")
</pallas_src>

<mosaic_0001>
module attributes {stable_mosaic.version = 11 : i64} {
  func.func @encoder_kernel(%arg0: i32, %arg1: memref<1x8x32xf32, #tpu.memory_space<vmem>>, %arg2: memref<1x8x8xf32, #tpu.memory_space<vmem>>, %arg3: memref<2x1x32xf32, #tpu.memory_space<vmem>>, %arg4: memref<2x1x32xf32, #tpu.memory_space<vmem>>, %arg5: memref<2x12x32x8xbf16, #tpu.memory_space<vmem>>, %arg6: memref<2x12x1x8xf32, #tpu.memory_space<vmem>>, %arg7: memref<2x4x8x32xbf16, #tpu.memory_space<vmem>>, %arg8: memref<2x1x32xf32, #tpu.memory_space<vmem>>, %arg9: memref<2x1x32xf32, #tpu.memory_space<vmem>>, %arg10: memref<2x1x32xf32, #tpu.memory_space<vmem>>, %arg11: memref<2x32x64xbf16, #tpu.memory_space<vmem>>, %arg12: memref<2x1x64xf32, #tpu.memory_space<vmem>>, %arg13: memref<2x64x32xbf16, #tpu.memory_space<vmem>>, %arg14: memref<2x1x32xf32, #tpu.memory_space<vmem>>, %arg15: memref<1x32xf32, #tpu.memory_space<vmem>>, %arg16: memref<1x32xf32, #tpu.memory_space<vmem>>, %arg17: memref<1x8x32xf32, #tpu.memory_space<vmem>>) attributes {dimension_semantics = [#tpu.dimension_semantics<parallel>], iteration_bounds = array<i64: 2>, scalar_prefetch = 0 : i64, scratch_operands = 0 : i64, tpu.core_type = #tpu.core_type<tc>, window_params = [{transform_indices = @transform_0, window_bounds = array<i64: 1, 8, 32>}, {transform_indices = @transform_1, window_bounds = array<i64: 1, 8, 8>}, {pipeline_mode = #tpu.pipeline_mode<synchronous>, transform_indices = @transform_2, window_bounds = array<i64: 2, 1, 32>}, {pipeline_mode = #tpu.pipeline_mode<synchronous>, transform_indices = @transform_3, window_bounds = array<i64: 2, 1, 32>}, {pipeline_mode = #tpu.pipeline_mode<synchronous>, transform_indices = @transform_4, window_bounds = array<i64: 2, 12, 32, 8>}, {pipeline_mode = #tpu.pipeline_mode<synchronous>, transform_indices = @transform_5, window_bounds = array<i64: 2, 12, 1, 8>}, {pipeline_mode = #tpu.pipeline_mode<synchronous>, transform_indices = @transform_6, window_bounds = array<i64: 2, 4, 8, 32>}, {pipeline_mode = #tpu.pipeline_mode<synchronous>, transform_indices = @transform_7, window_bounds = array<i64: 2, 1, 32>}, {pipeline_mode = #tpu.pipeline_mode<synchronous>, transform_indices = @transform_8, window_bounds = array<i64: 2, 1, 32>}, {pipeline_mode = #tpu.pipeline_mode<synchronous>, transform_indices = @transform_9, window_bounds = array<i64: 2, 1, 32>}, {pipeline_mode = #tpu.pipeline_mode<synchronous>, transform_indices = @transform_10, window_bounds = array<i64: 2, 32, 64>}, {pipeline_mode = #tpu.pipeline_mode<synchronous>, transform_indices = @transform_11, window_bounds = array<i64: 2, 1, 64>}, {pipeline_mode = #tpu.pipeline_mode<synchronous>, transform_indices = @transform_12, window_bounds = array<i64: 2, 64, 32>}, {pipeline_mode = #tpu.pipeline_mode<synchronous>, transform_indices = @transform_13, window_bounds = array<i64: 2, 1, 32>}, {pipeline_mode = #tpu.pipeline_mode<synchronous>, transform_indices = @transform_14, window_bounds = array<i64: 1, 32>}, {pipeline_mode = #tpu.pipeline_mode<synchronous>, transform_indices = @transform_15, window_bounds = array<i64: 1, 32>}, {transform_indices = @transform_16, window_bounds = array<i64: 1, 8, 32>}]} {
    %c0 = arith.constant 0 : index
    %c0_0 = arith.constant 0 : index
    %c0_1 = arith.constant 0 : index
    %0 = vector.load %arg1[%c0, %c0_0, %c0_1] : memref<1x8x32xf32, #tpu.memory_space<vmem>>, vector<1x8x32xf32>
    %1 = vector.shape_cast %0 : vector<1x8x32xf32> to vector<8x32xf32>
    %c0_2 = arith.constant 0 : index
    %c0_3 = arith.constant 0 : index
    %c0_4 = arith.constant 0 : index
    %2 = vector.load %arg2[%c0_2, %c0_3, %c0_4] : memref<1x8x8xf32, #tpu.memory_space<vmem>>, vector<1x8x8xf32>
    %3 = vector.shape_cast %2 : vector<1x8x8xf32> to vector<8x8xf32>
    %cst = arith.constant 0.000000e+00 : f32
    %4 = vector.broadcast %cst : f32 to vector<8x8xf32>
    %5 = arith.cmpf oeq, %3, %4 : vector<8x8xf32>
    %cst_5 = arith.constant -1.000000e+09 : f32
    %cst_6 = arith.constant 0.000000e+00 : f32
    %6 = vector.broadcast %cst_5 : f32 to vector<8x8xf32>
    %7 = vector.broadcast %cst_6 : f32 to vector<8x8xf32>
    %8 = arith.select %5, %6, %7 : vector<8x8xi1>, vector<8x8xf32>
    %9 = vector.shape_cast %8 : vector<8x8xf32> to vector<1x8x8xf32>
    %10 = vector.shape_cast %9 : vector<1x8x8xf32> to vector<1x8x8xf32>
    %11 = vector.broadcast %10 : vector<1x8x8xf32> to vector<4x8x8xf32>
    %c0_7 = arith.constant 0 : index
    %c0_8 = arith.constant 0 : index
    %c0_9 = arith.constant 0 : index
    %12 = vector.load %arg3[%c0_7, %c0_8, %c0_9] : memref<2x1x32xf32, #tpu.memory_space<vmem>>, vector<1x1x32xf32>
    %13 = vector.shape_cast %12 : vector<1x1x32xf32> to vector<1x32xf32>
    %c0_10 = arith.constant 0 : index
    %c0_11 = arith.constant 0 : index
    %c0_12 = arith.constant 0 : index
    %14 = vector.load %arg4[%c0_10, %c0_11, %c0_12] : memref<2x1x32xf32, #tpu.memory_space<vmem>>, vector<1x1x32xf32>
    %15 = vector.shape_cast %14 : vector<1x1x32xf32> to vector<1x32xf32>
    %cst_13 = arith.constant dense<0.000000e+00> : vector<8xf32>
    %16 = vector.multi_reduction <add>, %1, %cst_13 [1] : vector<8x32xf32> to vector<8xf32>
    %17 = vector.shape_cast %16 : vector<8xf32> to vector<8x1xf32>
    %cst_14 = arith.constant 3.200000e+01 : f32
    %18 = vector.broadcast %cst_14 : f32 to vector<8x1xf32>
    %19 = arith.divf %17, %18 : vector<8x1xf32>
    %20 = vector.broadcast %19 : vector<8x1xf32> to vector<8x32xf32>
    %21 = arith.subf %1, %20 : vector<8x32xf32>
    %22 = arith.mulf %21, %21 : vector<8x32xf32>
    %cst_15 = arith.constant dense<0.000000e+00> : vector<8xf32>
    %23 = vector.multi_reduction <add>, %22, %cst_15 [1] : vector<8x32xf32> to vector<8xf32>
    %24 = vector.shape_cast %23 : vector<8xf32> to vector<8x1xf32>
    %cst_16 = arith.constant 3.200000e+01 : f32
    %25 = vector.broadcast %cst_16 : f32 to vector<8x1xf32>
    %26 = arith.divf %24, %25 : vector<8x1xf32>
    %27 = vector.broadcast %19 : vector<8x1xf32> to vector<8x32xf32>
    %28 = arith.subf %1, %27 : vector<8x32xf32>
    %cst_17 = arith.constant 9.99999974E-6 : f32
    %29 = vector.broadcast %cst_17 : f32 to vector<8x1xf32>
    %30 = arith.addf %26, %29 : vector<8x1xf32>
    %31 = math.rsqrt %30 : vector<8x1xf32>
    %32 = vector.broadcast %31 : vector<8x1xf32> to vector<8x32xf32>
    %33 = arith.mulf %28, %32 : vector<8x32xf32>
    %34 = vector.broadcast %13 : vector<1x32xf32> to vector<8x32xf32>
    %35 = arith.mulf %33, %34 : vector<8x32xf32>
    %36 = vector.broadcast %15 : vector<1x32xf32> to vector<8x32xf32>
    %37 = arith.addf %35, %36 : vector<8x32xf32>
    %38 = arith.truncf %37 : vector<8x32xf32> to vector<8x32xbf16>
    %39 = vector.shape_cast %38 : vector<8x32xbf16> to vector<1x8x32xbf16>
    %40 = vector.shape_cast %39 : vector<1x8x32xbf16> to vector<1x8x32xbf16>
    %41 = vector.broadcast %40 : vector<1x8x32xbf16> to vector<12x8x32xbf16>
    %c0_18 = arith.constant 0 : index
    %c0_19 = arith.constant 0 : index
    %c0_20 = arith.constant 0 : index
    %c0_21 = arith.constant 0 : index
    %42 = vector.load %arg5[%c0_18, %c0_19, %c0_20, %c0_21] : memref<2x12x32x8xbf16, #tpu.memory_space<vmem>>, vector<1x12x32x8xbf16>
    %43 = vector.shape_cast %42 : vector<1x12x32x8xbf16> to vector<12x32x8xbf16>
    "tpu.trace_start"() <{level = 10 : i32, message = "gsd,gdf->gsf"}> : () -> ()
    %cst_22 = arith.constant dense<0.000000e+00> : vector<12x8x8xf32>
    %44 = tpu.matmul %41, %43, %cst_22 {dimension_numbers = #tpu.dot_dimension_numbers<[2], [1], [1], [2], [0, 0, 0, 1, 1, 2], [0], [0]>} : vector<12x8x32xbf16>, vector<12x32x8xbf16>, vector<12x8x8xf32> -> vector<12x8x8xf32>
    "tpu.trace_stop"() : () -> ()
    %c0_23 = arith.constant 0 : index
    %c0_24 = arith.constant 0 : index
    %c0_25 = arith.constant 0 : index
    %c0_26 = arith.constant 0 : index
    %45 = vector.load %arg6[%c0_23, %c0_24, %c0_25, %c0_26] : memref<2x12x1x8xf32, #tpu.memory_space<vmem>>, vector<1x12x1x8xf32>
    %46 = vector.shape_cast %45 : vector<1x12x1x8xf32> to vector<12x1x8xf32>
    %47 = vector.broadcast %46 : vector<12x1x8xf32> to vector<12x8x8xf32>
    %48 = arith.addf %44, %47 : vector<12x8x8xf32>
    %49 = arith.truncf %48 : vector<12x8x8xf32> to vector<12x8x8xbf16>
    %50 = vector.extract_strided_slice %49 {offsets = [0, 0, 0], sizes = [4, 8, 8], strides = [1, 1, 1]} : vector<12x8x8xbf16> to vector<4x8x8xbf16>
    %51 = vector.extract_strided_slice %49 {offsets = [4, 0, 0], sizes = [4, 8, 8], strides = [1, 1, 1]} : vector<12x8x8xbf16> to vector<4x8x8xbf16>
    %52 = vector.extract_strided_slice %49 {offsets = [8, 0, 0], sizes = [4, 8, 8], strides = [1, 1, 1]} : vector<12x8x8xbf16> to vector<4x8x8xbf16>
    "tpu.trace_start"() <{level = 10 : i32, message = "hqd,hkd->hqk"}> : () -> ()
    %cst_27 = arith.constant dense<0.000000e+00> : vector<4x8x8xf32>
    %53 = tpu.matmul %50, %51, %cst_27 {dimension_numbers = #tpu.dot_dimension_numbers<[2], [2], [1], [1], [0, 0, 0, 1, 1, 1], [0], [0]>} : vector<4x8x8xbf16>, vector<4x8x8xbf16>, vector<4x8x8xf32> -> vector<4x8x8xf32>
    "tpu.trace_stop"() : () -> ()
    %54 = arith.addf %53, %11 : vector<4x8x8xf32>
    %cst_28 = arith.constant dense<0xFF800000> : vector<4x8xf32>
    %55 = vector.multi_reduction <maximumf>, %54, %cst_28 [2] : vector<4x8x8xf32> to vector<4x8xf32>
    %56 = vector.shape_cast %55 : vector<4x8xf32> to vector<4x8x1xf32>
    %57 = vector.broadcast %56 : vector<4x8x1xf32> to vector<4x8x8xf32>
    %58 = arith.subf %54, %57 : vector<4x8x8xf32>
    %59 = math.exp %58 : vector<4x8x8xf32>
    %cst_29 = arith.constant dense<0.000000e+00> : vector<4x8xf32>
    %60 = vector.multi_reduction <add>, %59, %cst_29 [2] : vector<4x8x8xf32> to vector<4x8xf32>
    %61 = vector.shape_cast %60 : vector<4x8xf32> to vector<4x8x1xf32>
    %62 = tpu.reciprocal %61 {approx = true} : vector<4x8x1xf32> -> vector<4x8x1xf32>
    %63 = vector.broadcast %62 : vector<4x8x1xf32> to vector<4x8x8xf32>
    %64 = arith.mulf %59, %63 : vector<4x8x8xf32>
    %65 = arith.truncf %64 : vector<4x8x8xf32> to vector<4x8x8xbf16>
    "tpu.trace_start"() <{level = 10 : i32, message = "hqk,hkd->hqd"}> : () -> ()
    %cst_30 = arith.constant dense<0.000000e+00> : vector<4x8x8xf32>
    %66 = tpu.matmul %65, %52, %cst_30 {dimension_numbers = #tpu.dot_dimension_numbers<[2], [1], [1], [2], [0, 0, 0, 1, 1, 2], [0], [0]>} : vector<4x8x8xbf16>, vector<4x8x8xbf16>, vector<4x8x8xf32> -> vector<4x8x8xf32>
    "tpu.trace_stop"() : () -> ()
    %67 = arith.truncf %66 : vector<4x8x8xf32> to vector<4x8x8xbf16>
    %c0_31 = arith.constant 0 : index
    %c0_32 = arith.constant 0 : index
    %c0_33 = arith.constant 0 : index
    %c0_34 = arith.constant 0 : index
    %68 = vector.load %arg7[%c0_31, %c0_32, %c0_33, %c0_34] : memref<2x4x8x32xbf16, #tpu.memory_space<vmem>>, vector<1x4x8x32xbf16>
    %69 = vector.shape_cast %68 : vector<1x4x8x32xbf16> to vector<4x8x32xbf16>
    "tpu.trace_start"() <{level = 10 : i32, message = "hsd,hdo->hso"}> : () -> ()
    %cst_35 = arith.constant dense<0.000000e+00> : vector<4x8x32xf32>
    %70 = tpu.matmul %67, %69, %cst_35 {dimension_numbers = #tpu.dot_dimension_numbers<[2], [1], [1], [2], [0, 0, 0, 1, 1, 2], [0], [0]>} : vector<4x8x8xbf16>, vector<4x8x32xbf16>, vector<4x8x32xf32> -> vector<4x8x32xf32>
    "tpu.trace_stop"() : () -> ()
    %cst_36 = arith.constant dense<0.000000e+00> : vector<8x32xf32>
    %71 = vector.multi_reduction <add>, %70, %cst_36 [0] : vector<4x8x32xf32> to vector<8x32xf32>
    %72 = arith.addf %1, %71 : vector<8x32xf32>
    %c0_37 = arith.constant 0 : index
    %c0_38 = arith.constant 0 : index
    %c0_39 = arith.constant 0 : index
    %73 = vector.load %arg8[%c0_37, %c0_38, %c0_39] : memref<2x1x32xf32, #tpu.memory_space<vmem>>, vector<1x1x32xf32>
    %74 = vector.shape_cast %73 : vector<1x1x32xf32> to vector<1x32xf32>
    %75 = vector.broadcast %74 : vector<1x32xf32> to vector<8x32xf32>
    %76 = arith.addf %72, %75 : vector<8x32xf32>
    %c0_40 = arith.constant 0 : index
    %c0_41 = arith.constant 0 : index
    %c0_42 = arith.constant 0 : index
    %77 = vector.load %arg9[%c0_40, %c0_41, %c0_42] : memref<2x1x32xf32, #tpu.memory_space<vmem>>, vector<1x1x32xf32>
    %78 = vector.shape_cast %77 : vector<1x1x32xf32> to vector<1x32xf32>
    %c0_43 = arith.constant 0 : index
    %c0_44 = arith.constant 0 : index
    %c0_45 = arith.constant 0 : index
    %79 = vector.load %arg10[%c0_43, %c0_44, %c0_45] : memref<2x1x32xf32, #tpu.memory_space<vmem>>, vector<1x1x32xf32>
    %80 = vector.shape_cast %79 : vector<1x1x32xf32> to vector<1x32xf32>
    %cst_46 = arith.constant dense<0.000000e+00> : vector<8xf32>
    %81 = vector.multi_reduction <add>, %76, %cst_46 [1] : vector<8x32xf32> to vector<8xf32>
    %82 = vector.shape_cast %81 : vector<8xf32> to vector<8x1xf32>
    %cst_47 = arith.constant 3.200000e+01 : f32
    %83 = vector.broadcast %cst_47 : f32 to vector<8x1xf32>
    %84 = arith.divf %82, %83 : vector<8x1xf32>
    %85 = vector.broadcast %84 : vector<8x1xf32> to vector<8x32xf32>
    %86 = arith.subf %76, %85 : vector<8x32xf32>
    %87 = arith.mulf %86, %86 : vector<8x32xf32>
    %cst_48 = arith.constant dense<0.000000e+00> : vector<8xf32>
    %88 = vector.multi_reduction <add>, %87, %cst_48 [1] : vector<8x32xf32> to vector<8xf32>
    %89 = vector.shape_cast %88 : vector<8xf32> to vector<8x1xf32>
    %cst_49 = arith.constant 3.200000e+01 : f32
    %90 = vector.broadcast %cst_49 : f32 to vector<8x1xf32>
    %91 = arith.divf %89, %90 : vector<8x1xf32>
    %92 = vector.broadcast %84 : vector<8x1xf32> to vector<8x32xf32>
    %93 = arith.subf %76, %92 : vector<8x32xf32>
    %cst_50 = arith.constant 9.99999974E-6 : f32
    %94 = vector.broadcast %cst_50 : f32 to vector<8x1xf32>
    %95 = arith.addf %91, %94 : vector<8x1xf32>
    %96 = math.rsqrt %95 : vector<8x1xf32>
    %97 = vector.broadcast %96 : vector<8x1xf32> to vector<8x32xf32>
    %98 = arith.mulf %93, %97 : vector<8x32xf32>
    %99 = vector.broadcast %78 : vector<1x32xf32> to vector<8x32xf32>
    %100 = arith.mulf %98, %99 : vector<8x32xf32>
    %101 = vector.broadcast %80 : vector<1x32xf32> to vector<8x32xf32>
    %102 = arith.addf %100, %101 : vector<8x32xf32>
    %103 = arith.truncf %102 : vector<8x32xf32> to vector<8x32xbf16>
    %c0_51 = arith.constant 0 : index
    %c0_52 = arith.constant 0 : index
    %c0_53 = arith.constant 0 : index
    %104 = vector.load %arg11[%c0_51, %c0_52, %c0_53] : memref<2x32x64xbf16, #tpu.memory_space<vmem>>, vector<1x32x64xbf16>
    %105 = vector.shape_cast %104 : vector<1x32x64xbf16> to vector<32x64xbf16>
    %cst_54 = arith.constant dense<0.000000e+00> : vector<8x64xf32>
    %106 = tpu.matmul %103, %105, %cst_54 {dimension_numbers = #tpu.dot_dimension_numbers<[1], [0], [0], [1], [0, 0, 1, 1], [], []>} : vector<8x32xbf16>, vector<32x64xbf16>, vector<8x64xf32> -> vector<8x64xf32>
    %c0_55 = arith.constant 0 : index
    %c0_56 = arith.constant 0 : index
    %c0_57 = arith.constant 0 : index
    %107 = vector.load %arg12[%c0_55, %c0_56, %c0_57] : memref<2x1x64xf32, #tpu.memory_space<vmem>>, vector<1x1x64xf32>
    %108 = vector.shape_cast %107 : vector<1x1x64xf32> to vector<1x64xf32>
    %109 = vector.broadcast %108 : vector<1x64xf32> to vector<8x64xf32>
    %110 = arith.addf %106, %109 : vector<8x64xf32>
    %cst_58 = arith.constant 0.000000e+00 : f32
    %111 = vector.broadcast %cst_58 : f32 to vector<8x64xf32>
    %112 = arith.maximumf %110, %111 : vector<8x64xf32>
    %113 = arith.truncf %112 : vector<8x64xf32> to vector<8x64xbf16>
    %c0_59 = arith.constant 0 : index
    %c0_60 = arith.constant 0 : index
    %c0_61 = arith.constant 0 : index
    %114 = vector.load %arg13[%c0_59, %c0_60, %c0_61] : memref<2x64x32xbf16, #tpu.memory_space<vmem>>, vector<1x64x32xbf16>
    %115 = vector.shape_cast %114 : vector<1x64x32xbf16> to vector<64x32xbf16>
    %cst_62 = arith.constant dense<0.000000e+00> : vector<8x32xf32>
    %116 = tpu.matmul %113, %115, %cst_62 {dimension_numbers = #tpu.dot_dimension_numbers<[1], [0], [0], [1], [0, 0, 1, 1], [], []>} : vector<8x64xbf16>, vector<64x32xbf16>, vector<8x32xf32> -> vector<8x32xf32>
    %c0_63 = arith.constant 0 : index
    %c0_64 = arith.constant 0 : index
    %c0_65 = arith.constant 0 : index
    %117 = vector.load %arg14[%c0_63, %c0_64, %c0_65] : memref<2x1x32xf32, #tpu.memory_space<vmem>>, vector<1x1x32xf32>
    %118 = vector.shape_cast %117 : vector<1x1x32xf32> to vector<1x32xf32>
    %119 = vector.broadcast %118 : vector<1x32xf32> to vector<8x32xf32>
    %120 = arith.addf %116, %119 : vector<8x32xf32>
    %121 = arith.addf %76, %120 : vector<8x32xf32>
    %c1 = arith.constant 1 : index
    %c0_66 = arith.constant 0 : index
    %c0_67 = arith.constant 0 : index
    %122 = vector.load %arg3[%c1, %c0_66, %c0_67] : memref<2x1x32xf32, #tpu.memory_space<vmem>>, vector<1x1x32xf32>
    %123 = vector.shape_cast %122 : vector<1x1x32xf32> to vector<1x32xf32>
    %c1_68 = arith.constant 1 : index
    %c0_69 = arith.constant 0 : index
    %c0_70 = arith.constant 0 : index
    %124 = vector.load %arg4[%c1_68, %c0_69, %c0_70] : memref<2x1x32xf32, #tpu.memory_space<vmem>>, vector<1x1x32xf32>
    %125 = vector.shape_cast %124 : vector<1x1x32xf32> to vector<1x32xf32>
    %cst_71 = arith.constant dense<0.000000e+00> : vector<8xf32>
    %126 = vector.multi_reduction <add>, %121, %cst_71 [1] : vector<8x32xf32> to vector<8xf32>
    %127 = vector.shape_cast %126 : vector<8xf32> to vector<8x1xf32>
    %cst_72 = arith.constant 3.200000e+01 : f32
    %128 = vector.broadcast %cst_72 : f32 to vector<8x1xf32>
    %129 = arith.divf %127, %128 : vector<8x1xf32>
    %130 = vector.broadcast %129 : vector<8x1xf32> to vector<8x32xf32>
    %131 = arith.subf %121, %130 : vector<8x32xf32>
    %132 = arith.mulf %131, %131 : vector<8x32xf32>
    %cst_73 = arith.constant dense<0.000000e+00> : vector<8xf32>
    %133 = vector.multi_reduction <add>, %132, %cst_73 [1] : vector<8x32xf32> to vector<8xf32>
    %134 = vector.shape_cast %133 : vector<8xf32> to vector<8x1xf32>
    %cst_74 = arith.constant 3.200000e+01 : f32
    %135 = vector.broadcast %cst_74 : f32 to vector<8x1xf32>
    %136 = arith.divf %134, %135 : vector<8x1xf32>
    %137 = vector.broadcast %129 : vector<8x1xf32> to vector<8x32xf32>
    %138 = arith.subf %121, %137 : vector<8x32xf32>
    %cst_75 = arith.constant 9.99999974E-6 : f32
    %139 = vector.broadcast %cst_75 : f32 to vector<8x1xf32>
    %140 = arith.addf %136, %139 : vector<8x1xf32>
    %141 = math.rsqrt %140 : vector<8x1xf32>
    %142 = vector.broadcast %141 : vector<8x1xf32> to vector<8x32xf32>
    %143 = arith.mulf %138, %142 : vector<8x32xf32>
    %144 = vector.broadcast %123 : vector<1x32xf32> to vector<8x32xf32>
    %145 = arith.mulf %143, %144 : vector<8x32xf32>
    %146 = vector.broadcast %125 : vector<1x32xf32> to vector<8x32xf32>
    %147 = arith.addf %145, %146 : vector<8x32xf32>
    %148 = arith.truncf %147 : vector<8x32xf32> to vector<8x32xbf16>
    %149 = vector.shape_cast %148 : vector<8x32xbf16> to vector<1x8x32xbf16>
    %150 = vector.shape_cast %149 : vector<1x8x32xbf16> to vector<1x8x32xbf16>
    %151 = vector.broadcast %150 : vector<1x8x32xbf16> to vector<12x8x32xbf16>
    %c1_76 = arith.constant 1 : index
    %c0_77 = arith.constant 0 : index
    %c0_78 = arith.constant 0 : index
    %c0_79 = arith.constant 0 : index
    %152 = vector.load %arg5[%c1_76, %c0_77, %c0_78, %c0_79] : memref<2x12x32x8xbf16, #tpu.memory_space<vmem>>, vector<1x12x32x8xbf16>
    %153 = vector.shape_cast %152 : vector<1x12x32x8xbf16> to vector<12x32x8xbf16>
    "tpu.trace_start"() <{level = 10 : i32, message = "gsd,gdf->gsf"}> : () -> ()
    %cst_80 = arith.constant dense<0.000000e+00> : vector<12x8x8xf32>
    %154 = tpu.matmul %151, %153, %cst_80 {dimension_numbers = #tpu.dot_dimension_numbers<[2], [1], [1], [2], [0, 0, 0, 1, 1, 2], [0], [0]>} : vector<12x8x32xbf16>, vector<12x32x8xbf16>, vector<12x8x8xf32> -> vector<12x8x8xf32>
    "tpu.trace_stop"() : () -> ()
    %c1_81 = arith.constant 1 : index
    %c0_82 = arith.constant 0 : index
    %c0_83 = arith.constant 0 : index
    %c0_84 = arith.constant 0 : index
    %155 = vector.load %arg6[%c1_81, %c0_82, %c0_83, %c0_84] : memref<2x12x1x8xf32, #tpu.memory_space<vmem>>, vector<1x12x1x8xf32>
    %156 = vector.shape_cast %155 : vector<1x12x1x8xf32> to vector<12x1x8xf32>
    %157 = vector.broadcast %156 : vector<12x1x8xf32> to vector<12x8x8xf32>
    %158 = arith.addf %154, %157 : vector<12x8x8xf32>
    %159 = arith.truncf %158 : vector<12x8x8xf32> to vector<12x8x8xbf16>
    %160 = vector.extract_strided_slice %159 {offsets = [0, 0, 0], sizes = [4, 8, 8], strides = [1, 1, 1]} : vector<12x8x8xbf16> to vector<4x8x8xbf16>
    %161 = vector.extract_strided_slice %159 {offsets = [4, 0, 0], sizes = [4, 8, 8], strides = [1, 1, 1]} : vector<12x8x8xbf16> to vector<4x8x8xbf16>
    %162 = vector.extract_strided_slice %159 {offsets = [8, 0, 0], sizes = [4, 8, 8], strides = [1, 1, 1]} : vector<12x8x8xbf16> to vector<4x8x8xbf16>
    "tpu.trace_start"() <{level = 10 : i32, message = "hqd,hkd->hqk"}> : () -> ()
    %cst_85 = arith.constant dense<0.000000e+00> : vector<4x8x8xf32>
    %163 = tpu.matmul %160, %161, %cst_85 {dimension_numbers = #tpu.dot_dimension_numbers<[2], [2], [1], [1], [0, 0, 0, 1, 1, 1], [0], [0]>} : vector<4x8x8xbf16>, vector<4x8x8xbf16>, vector<4x8x8xf32> -> vector<4x8x8xf32>
    "tpu.trace_stop"() : () -> ()
    %164 = arith.addf %163, %11 : vector<4x8x8xf32>
    %cst_86 = arith.constant dense<0xFF800000> : vector<4x8xf32>
    %165 = vector.multi_reduction <maximumf>, %164, %cst_86 [2] : vector<4x8x8xf32> to vector<4x8xf32>
    %166 = vector.shape_cast %165 : vector<4x8xf32> to vector<4x8x1xf32>
    %167 = vector.broadcast %166 : vector<4x8x1xf32> to vector<4x8x8xf32>
    %168 = arith.subf %164, %167 : vector<4x8x8xf32>
    %169 = math.exp %168 : vector<4x8x8xf32>
    %cst_87 = arith.constant dense<0.000000e+00> : vector<4x8xf32>
    %170 = vector.multi_reduction <add>, %169, %cst_87 [2] : vector<4x8x8xf32> to vector<4x8xf32>
    %171 = vector.shape_cast %170 : vector<4x8xf32> to vector<4x8x1xf32>
    %172 = tpu.reciprocal %171 {approx = true} : vector<4x8x1xf32> -> vector<4x8x1xf32>
    %173 = vector.broadcast %172 : vector<4x8x1xf32> to vector<4x8x8xf32>
    %174 = arith.mulf %169, %173 : vector<4x8x8xf32>
    %175 = arith.truncf %174 : vector<4x8x8xf32> to vector<4x8x8xbf16>
    "tpu.trace_start"() <{level = 10 : i32, message = "hqk,hkd->hqd"}> : () -> ()
    %cst_88 = arith.constant dense<0.000000e+00> : vector<4x8x8xf32>
    %176 = tpu.matmul %175, %162, %cst_88 {dimension_numbers = #tpu.dot_dimension_numbers<[2], [1], [1], [2], [0, 0, 0, 1, 1, 2], [0], [0]>} : vector<4x8x8xbf16>, vector<4x8x8xbf16>, vector<4x8x8xf32> -> vector<4x8x8xf32>
    "tpu.trace_stop"() : () -> ()
    %177 = arith.truncf %176 : vector<4x8x8xf32> to vector<4x8x8xbf16>
    %c1_89 = arith.constant 1 : index
    %c0_90 = arith.constant 0 : index
    %c0_91 = arith.constant 0 : index
    %c0_92 = arith.constant 0 : index
    %178 = vector.load %arg7[%c1_89, %c0_90, %c0_91, %c0_92] : memref<2x4x8x32xbf16, #tpu.memory_space<vmem>>, vector<1x4x8x32xbf16>
    %179 = vector.shape_cast %178 : vector<1x4x8x32xbf16> to vector<4x8x32xbf16>
    "tpu.trace_start"() <{level = 10 : i32, message = "hsd,hdo->hso"}> : () -> ()
    %cst_93 = arith.constant dense<0.000000e+00> : vector<4x8x32xf32>
    %180 = tpu.matmul %177, %179, %cst_93 {dimension_numbers = #tpu.dot_dimension_numbers<[2], [1], [1], [2], [0, 0, 0, 1, 1, 2], [0], [0]>} : vector<4x8x8xbf16>, vector<4x8x32xbf16>, vector<4x8x32xf32> -> vector<4x8x32xf32>
    "tpu.trace_stop"() : () -> ()
    %cst_94 = arith.constant dense<0.000000e+00> : vector<8x32xf32>
    %181 = vector.multi_reduction <add>, %180, %cst_94 [0] : vector<4x8x32xf32> to vector<8x32xf32>
    %182 = arith.addf %121, %181 : vector<8x32xf32>
    %c1_95 = arith.constant 1 : index
    %c0_96 = arith.constant 0 : index
    %c0_97 = arith.constant 0 : index
    %183 = vector.load %arg8[%c1_95, %c0_96, %c0_97] : memref<2x1x32xf32, #tpu.memory_space<vmem>>, vector<1x1x32xf32>
    %184 = vector.shape_cast %183 : vector<1x1x32xf32> to vector<1x32xf32>
    %185 = vector.broadcast %184 : vector<1x32xf32> to vector<8x32xf32>
    %186 = arith.addf %182, %185 : vector<8x32xf32>
    %c1_98 = arith.constant 1 : index
    %c0_99 = arith.constant 0 : index
    %c0_100 = arith.constant 0 : index
    %187 = vector.load %arg9[%c1_98, %c0_99, %c0_100] : memref<2x1x32xf32, #tpu.memory_space<vmem>>, vector<1x1x32xf32>
    %188 = vector.shape_cast %187 : vector<1x1x32xf32> to vector<1x32xf32>
    %c1_101 = arith.constant 1 : index
    %c0_102 = arith.constant 0 : index
    %c0_103 = arith.constant 0 : index
    %189 = vector.load %arg10[%c1_101, %c0_102, %c0_103] : memref<2x1x32xf32, #tpu.memory_space<vmem>>, vector<1x1x32xf32>
    %190 = vector.shape_cast %189 : vector<1x1x32xf32> to vector<1x32xf32>
    %cst_104 = arith.constant dense<0.000000e+00> : vector<8xf32>
    %191 = vector.multi_reduction <add>, %186, %cst_104 [1] : vector<8x32xf32> to vector<8xf32>
    %192 = vector.shape_cast %191 : vector<8xf32> to vector<8x1xf32>
    %cst_105 = arith.constant 3.200000e+01 : f32
    %193 = vector.broadcast %cst_105 : f32 to vector<8x1xf32>
    %194 = arith.divf %192, %193 : vector<8x1xf32>
    %195 = vector.broadcast %194 : vector<8x1xf32> to vector<8x32xf32>
    %196 = arith.subf %186, %195 : vector<8x32xf32>
    %197 = arith.mulf %196, %196 : vector<8x32xf32>
    %cst_106 = arith.constant dense<0.000000e+00> : vector<8xf32>
    %198 = vector.multi_reduction <add>, %197, %cst_106 [1] : vector<8x32xf32> to vector<8xf32>
    %199 = vector.shape_cast %198 : vector<8xf32> to vector<8x1xf32>
    %cst_107 = arith.constant 3.200000e+01 : f32
    %200 = vector.broadcast %cst_107 : f32 to vector<8x1xf32>
    %201 = arith.divf %199, %200 : vector<8x1xf32>
    %202 = vector.broadcast %194 : vector<8x1xf32> to vector<8x32xf32>
    %203 = arith.subf %186, %202 : vector<8x32xf32>
    %cst_108 = arith.constant 9.99999974E-6 : f32
    %204 = vector.broadcast %cst_108 : f32 to vector<8x1xf32>
    %205 = arith.addf %201, %204 : vector<8x1xf32>
    %206 = math.rsqrt %205 : vector<8x1xf32>
    %207 = vector.broadcast %206 : vector<8x1xf32> to vector<8x32xf32>
    %208 = arith.mulf %203, %207 : vector<8x32xf32>
    %209 = vector.broadcast %188 : vector<1x32xf32> to vector<8x32xf32>
    %210 = arith.mulf %208, %209 : vector<8x32xf32>
    %211 = vector.broadcast %190 : vector<1x32xf32> to vector<8x32xf32>
    %212 = arith.addf %210, %211 : vector<8x32xf32>
    %213 = arith.truncf %212 : vector<8x32xf32> to vector<8x32xbf16>
    %c1_109 = arith.constant 1 : index
    %c0_110 = arith.constant 0 : index
    %c0_111 = arith.constant 0 : index
    %214 = vector.load %arg11[%c1_109, %c0_110, %c0_111] : memref<2x32x64xbf16, #tpu.memory_space<vmem>>, vector<1x32x64xbf16>
    %215 = vector.shape_cast %214 : vector<1x32x64xbf16> to vector<32x64xbf16>
    %cst_112 = arith.constant dense<0.000000e+00> : vector<8x64xf32>
    %216 = tpu.matmul %213, %215, %cst_112 {dimension_numbers = #tpu.dot_dimension_numbers<[1], [0], [0], [1], [0, 0, 1, 1], [], []>} : vector<8x32xbf16>, vector<32x64xbf16>, vector<8x64xf32> -> vector<8x64xf32>
    %c1_113 = arith.constant 1 : index
    %c0_114 = arith.constant 0 : index
    %c0_115 = arith.constant 0 : index
    %217 = vector.load %arg12[%c1_113, %c0_114, %c0_115] : memref<2x1x64xf32, #tpu.memory_space<vmem>>, vector<1x1x64xf32>
    %218 = vector.shape_cast %217 : vector<1x1x64xf32> to vector<1x64xf32>
    %219 = vector.broadcast %218 : vector<1x64xf32> to vector<8x64xf32>
    %220 = arith.addf %216, %219 : vector<8x64xf32>
    %cst_116 = arith.constant 0.000000e+00 : f32
    %221 = vector.broadcast %cst_116 : f32 to vector<8x64xf32>
    %222 = arith.maximumf %220, %221 : vector<8x64xf32>
    %223 = arith.truncf %222 : vector<8x64xf32> to vector<8x64xbf16>
    %c1_117 = arith.constant 1 : index
    %c0_118 = arith.constant 0 : index
    %c0_119 = arith.constant 0 : index
    %224 = vector.load %arg13[%c1_117, %c0_118, %c0_119] : memref<2x64x32xbf16, #tpu.memory_space<vmem>>, vector<1x64x32xbf16>
    %225 = vector.shape_cast %224 : vector<1x64x32xbf16> to vector<64x32xbf16>
    %cst_120 = arith.constant dense<0.000000e+00> : vector<8x32xf32>
    %226 = tpu.matmul %223, %225, %cst_120 {dimension_numbers = #tpu.dot_dimension_numbers<[1], [0], [0], [1], [0, 0, 1, 1], [], []>} : vector<8x64xbf16>, vector<64x32xbf16>, vector<8x32xf32> -> vector<8x32xf32>
    %c1_121 = arith.constant 1 : index
    %c0_122 = arith.constant 0 : index
    %c0_123 = arith.constant 0 : index
    %227 = vector.load %arg14[%c1_121, %c0_122, %c0_123] : memref<2x1x32xf32, #tpu.memory_space<vmem>>, vector<1x1x32xf32>
    %228 = vector.shape_cast %227 : vector<1x1x32xf32> to vector<1x32xf32>
    %229 = vector.broadcast %228 : vector<1x32xf32> to vector<8x32xf32>
    %230 = arith.addf %226, %229 : vector<8x32xf32>
    %231 = arith.addf %186, %230 : vector<8x32xf32>
    %c0_124 = arith.constant 0 : index
    %c0_125 = arith.constant 0 : index
    %232 = vector.load %arg15[%c0_124, %c0_125] : memref<1x32xf32, #tpu.memory_space<vmem>>, vector<1x32xf32>
    %c0_126 = arith.constant 0 : index
    %c0_127 = arith.constant 0 : index
    %233 = vector.load %arg16[%c0_126, %c0_127] : memref<1x32xf32, #tpu.memory_space<vmem>>, vector<1x32xf32>
    %cst_128 = arith.constant dense<0.000000e+00> : vector<8xf32>
    %234 = vector.multi_reduction <add>, %231, %cst_128 [1] : vector<8x32xf32> to vector<8xf32>
    %235 = vector.shape_cast %234 : vector<8xf32> to vector<8x1xf32>
    %cst_129 = arith.constant 3.200000e+01 : f32
    %236 = vector.broadcast %cst_129 : f32 to vector<8x1xf32>
    %237 = arith.divf %235, %236 : vector<8x1xf32>
    %238 = vector.broadcast %237 : vector<8x1xf32> to vector<8x32xf32>
    %239 = arith.subf %231, %238 : vector<8x32xf32>
    %240 = arith.mulf %239, %239 : vector<8x32xf32>
    %cst_130 = arith.constant dense<0.000000e+00> : vector<8xf32>
    %241 = vector.multi_reduction <add>, %240, %cst_130 [1] : vector<8x32xf32> to vector<8xf32>
    %242 = vector.shape_cast %241 : vector<8xf32> to vector<8x1xf32>
    %cst_131 = arith.constant 3.200000e+01 : f32
    %243 = vector.broadcast %cst_131 : f32 to vector<8x1xf32>
    %244 = arith.divf %242, %243 : vector<8x1xf32>
    %245 = vector.broadcast %237 : vector<8x1xf32> to vector<8x32xf32>
    %246 = arith.subf %231, %245 : vector<8x32xf32>
    %cst_132 = arith.constant 9.99999974E-6 : f32
    %247 = vector.broadcast %cst_132 : f32 to vector<8x1xf32>
    %248 = arith.addf %244, %247 : vector<8x1xf32>
    %249 = math.rsqrt %248 : vector<8x1xf32>
    %250 = vector.broadcast %249 : vector<8x1xf32> to vector<8x32xf32>
    %251 = arith.mulf %246, %250 : vector<8x32xf32>
    %252 = vector.broadcast %232 : vector<1x32xf32> to vector<8x32xf32>
    %253 = arith.mulf %251, %252 : vector<8x32xf32>
    %254 = vector.broadcast %233 : vector<1x32xf32> to vector<8x32xf32>
    %255 = arith.addf %253, %254 : vector<8x32xf32>
    %c0_133 = arith.constant 0 : index
    %c0_134 = arith.constant 0 : index
    %c0_135 = arith.constant 0 : index
    %256 = vector.load %arg17[%c0_133, %c0_134, %c0_135] : memref<1x8x32xf32, #tpu.memory_space<vmem>>, vector<1x8x32xf32>
    %257 = vector.shape_cast %256 : vector<1x8x32xf32> to vector<8x32xf32>
    %258 = vector.shape_cast %255 : vector<8x32xf32> to vector<1x8x32xf32>
    tpu.vector_store %arg17[%c0_133, %c0_134, %c0_135], %258 {strides = array<i32>} : memref<1x8x32xf32, #tpu.memory_space<vmem>>, vector<1x8x32xf32>,
    return
  }
  func.func @transform_0(%arg0: i32) -> (i32, i32, i32) {
    %c0_i32 = arith.constant 0 : i32
    %c0_i32_0 = arith.constant 0 : i32
    %c0_i32_1 = arith.constant 0 : i32
    return %arg0, %c0_i32, %c0_i32_0 : i32, i32, i32
  }
  func.func @transform_1(%arg0: i32) -> (i32, i32, i32) {
    %c0_i32 = arith.constant 0 : i32
    %c0_i32_0 = arith.constant 0 : i32
    %c0_i32_1 = arith.constant 0 : i32
    return %arg0, %c0_i32, %c0_i32_0 : i32, i32, i32
  }
  func.func @transform_2(%arg0: i32) -> (i32, i32, i32) {
    %c0_i32 = arith.constant 0 : i32
    %c0_i32_0 = arith.constant 0 : i32
    %c0_i32_1 = arith.constant 0 : i32
    %c0_i32_2 = arith.constant 0 : i32
    return %c0_i32, %c0_i32_0, %c0_i32_1 : i32, i32, i32
  }
  func.func @transform_3(%arg0: i32) -> (i32, i32, i32) {
    %c0_i32 = arith.constant 0 : i32
    %c0_i32_0 = arith.constant 0 : i32
    %c0_i32_1 = arith.constant 0 : i32
    %c0_i32_2 = arith.constant 0 : i32
    return %c0_i32, %c0_i32_0, %c0_i32_1 : i32, i32, i32
  }
  func.func @transform_4(%arg0: i32) -> (i32, i32, i32, i32) {
    %c0_i32 = arith.constant 0 : i32
    %c0_i32_0 = arith.constant 0 : i32
    %c0_i32_1 = arith.constant 0 : i32
    %c0_i32_2 = arith.constant 0 : i32
    %c0_i32_3 = arith.constant 0 : i32
    return %c0_i32, %c0_i32_0, %c0_i32_1, %c0_i32_2 : i32, i32, i32, i32
  }
  func.func @transform_5(%arg0: i32) -> (i32, i32, i32, i32) {
    %c0_i32 = arith.constant 0 : i32
    %c0_i32_0 = arith.constant 0 : i32
    %c0_i32_1 = arith.constant 0 : i32
    %c0_i32_2 = arith.constant 0 : i32
    %c0_i32_3 = arith.constant 0 : i32
    return %c0_i32, %c0_i32_0, %c0_i32_1, %c0_i32_2 : i32, i32, i32, i32
  }
  func.func @transform_6(%arg0: i32) -> (i32, i32, i32, i32) {
    %c0_i32 = arith.constant 0 : i32
    %c0_i32_0 = arith.constant 0 : i32
    %c0_i32_1 = arith.constant 0 : i32
    %c0_i32_2 = arith.constant 0 : i32
    %c0_i32_3 = arith.constant 0 : i32
    return %c0_i32, %c0_i32_0, %c0_i32_1, %c0_i32_2 : i32, i32, i32, i32
  }
  func.func @transform_7(%arg0: i32) -> (i32, i32, i32) {
    %c0_i32 = arith.constant 0 : i32
    %c0_i32_0 = arith.constant 0 : i32
    %c0_i32_1 = arith.constant 0 : i32
    %c0_i32_2 = arith.constant 0 : i32
    return %c0_i32, %c0_i32_0, %c0_i32_1 : i32, i32, i32
  }
  func.func @transform_8(%arg0: i32) -> (i32, i32, i32) {
    %c0_i32 = arith.constant 0 : i32
    %c0_i32_0 = arith.constant 0 : i32
    %c0_i32_1 = arith.constant 0 : i32
    %c0_i32_2 = arith.constant 0 : i32
    return %c0_i32, %c0_i32_0, %c0_i32_1 : i32, i32, i32
  }
  func.func @transform_9(%arg0: i32) -> (i32, i32, i32) {
    %c0_i32 = arith.constant 0 : i32
    %c0_i32_0 = arith.constant 0 : i32
    %c0_i32_1 = arith.constant 0 : i32
    %c0_i32_2 = arith.constant 0 : i32
    return %c0_i32, %c0_i32_0, %c0_i32_1 : i32, i32, i32
  }
  func.func @transform_10(%arg0: i32) -> (i32, i32, i32) {
    %c0_i32 = arith.constant 0 : i32
    %c0_i32_0 = arith.constant 0 : i32
    %c0_i32_1 = arith.constant 0 : i32
    %c0_i32_2 = arith.constant 0 : i32
    return %c0_i32, %c0_i32_0, %c0_i32_1 : i32, i32, i32
  }
  func.func @transform_11(%arg0: i32) -> (i32, i32, i32) {
    %c0_i32 = arith.constant 0 : i32
    %c0_i32_0 = arith.constant 0 : i32
    %c0_i32_1 = arith.constant 0 : i32
    %c0_i32_2 = arith.constant 0 : i32
    return %c0_i32, %c0_i32_0, %c0_i32_1 : i32, i32, i32
  }
  func.func @transform_12(%arg0: i32) -> (i32, i32, i32) {
    %c0_i32 = arith.constant 0 : i32
    %c0_i32_0 = arith.constant 0 : i32
    %c0_i32_1 = arith.constant 0 : i32
    %c0_i32_2 = arith.constant 0 : i32
    return %c0_i32, %c0_i32_0, %c0_i32_1 : i32, i32, i32
  }
  func.func @transform_13(%arg0: i32) -> (i32, i32, i32) {
    %c0_i32 = arith.constant 0 : i32
    %c0_i32_0 = arith.constant 0 : i32
    %c0_i32_1 = arith.constant 0 : i32
    %c0_i32_2 = arith.constant 0 : i32
    return %c0_i32, %c0_i32_0, %c0_i32_1 : i32, i32, i32
  }
  func.func @transform_14(%arg0: i32) -> (i32, i32) {
    %c0_i32 = arith.constant 0 : i32
    %c0_i32_0 = arith.constant 0 : i32
    %c0_i32_1 = arith.constant 0 : i32
    return %c0_i32, %c0_i32_0 : i32, i32
  }
  func.func @transform_15(%arg0: i32) -> (i32, i32) {
    %c0_i32 = arith.constant 0 : i32
    %c0_i32_0 = arith.constant 0 : i32
    %c0_i32_1 = arith.constant 0 : i32
    return %c0_i32, %c0_i32_0 : i32, i32
  }
  func.func @transform_16(%arg0: i32) -> (i32, i32, i32) {
    %c0_i32 = arith.constant 0 : i32
    %c0_i32_0 = arith.constant 0 : i32
    %c0_i32_1 = arith.constant 0 : i32
    return %arg0, %c0_i32, %c0_i32_0 : i32, i32, i32
  }
}

</mosaic_0001>

<bundles_post_ra>
// kernel: tpu_custom_call.1
= control target key start
LH: loop header
LB: loop body
LE: loop exit
PB: predicated region body
PF: predicated region fallthrough
CT: control target
= control target key end

     0   :  { %s3696_s0 = inlined_call_operand.vmem [shape: f32[2,8,32], index: 0, kind: input, shape index: {}]   ;;  %s3697_s1 = inlined_call_operand.vmem [shape: f32[2,8,8], index: 1, kind: input, shape index: {}]   ;;  %s3698_s2 = inlined_call_operand.vmem [shape: f32[2,1,32], index: 2, kind: input, shape index: {}]   ;;  %s3699_s3 = inlined_call_operand.vmem [shape: f32[2,1,32], index: 3, kind: input, shape index: {}]   ;;  %s3700_s4 = inlined_call_operand.vmem [shape: bf16[2,12,32,8], index: 4, kind: input, shape index: {}]   ;;  %s3701_s5 = inlined_call_operand.vmem [shape: f32[2,12,1,8], index: 5, kind: input, shape index: {}]   ;;  %s3702_s6 = inlined_call_operand.vmem [shape: bf16[2,4,8,32], index: 6, kind: input, shape index: {}]   ;;  %s3703_s7 = inlined_call_operand.vmem [shape: f32[2,1,32], index: 7, kind: input, shape index: {}]   ;;  %s3704_s8 = inlined_call_operand.vmem [shape: f32[2,1,32], index: 8, kind: input, shape index: {}]   ;;  %s3705_s9 = inlined_call_operand.vmem [shape: f32[2,1,32], index: 9, kind: input, shape index: {}]   ;;  %s3706_s10 = inlined_call_operand.vmem [shape: bf16[2,32,64], index: 10, kind: input, shape index: {}]   ;;  %s3707_s11 = inlined_call_operand.vmem [shape: f32[2,1,64], index: 11, kind: input, shape index: {}]   ;;  %s3708_s12 = inlined_call_operand.vmem [shape: bf16[2,64,32], index: 12, kind: input, shape index: {}]   ;;  %s3709_s13 = inlined_call_operand.vmem [shape: f32[2,1,32], index: 13, kind: input, shape index: {}]   ;;  %s3710_s14 = inlined_call_operand.vmem [shape: f32[1,32], index: 14, kind: input, shape index: {}]   ;;  %s3711_s15 = inlined_call_operand.vmem [shape: f32[1,32], index: 15, kind: input, shape index: {}]   ;;  %s3712_s16 = inlined_call_operand.hbm [shape: f32[2,8,32], index: 16, kind: output, shape index: {}]  }
   0x1   :  { %3719 = sst [smem:[#allocation10_spill]] %s3696_s0 }
   0x2   :  { %3720 = sst [smem:[#allocation11_spill]] %s3697_s1 }
   0x3   :  { %21 = vsyncpa [#allocation3], 0 }
   0x4   :  { %23 = vsyncpa [#allocation3 + $0x1], 0  ;;  %s3134_s21 = smov 0   ;;  %s3136_s22 = smov 0  }
   0x5   :  { %s3138_s23 = smov 0   ;;  %s3140_s24 = smov 0  }
   0x6 LB: > { %3721 = sst [smem:[#allocation5_spill]] %s3033_s21  ;;  %s3155_s25 = sadd.s32 4294967295, %s3045_s24   ;;  %s3045_s24 = sphi %s3140_s24, %s3733_s24   ;;  %s3041_s23 = sphi %s3138_s23, %s3735_s23   ;;  %s3037_s22 = sphi %s3136_s22, %s3737_s22   ;;  %s3033_s21 = sphi %s3134_s21, %s3736_s21  }
   0x7   : > { %3722 = sst [smem:[#allocation6_spill]] %s3041_s23  ;;  %s2412_s26 = sadd.s32 4294967294, %s3045_s24  }
   0x8   : > { %s3159_s27 = sadd.s32 1, %s3045_s24   ;;  %s382_s28 = sadd.s32 1, %s3041_s23 }
   0x9   : > { %3723 = sst [smem:[#allocation7_spill]] %s3159_s27  ;;  %s379_s29 = ssub.s32 %s3045_s24, %s3159_s27 }
   0xa   : > { %p392_p0 = scmp.ne.s32.totalorder %s3041_s23, %s3037_s22  ;;  %p380_p1 = scmp.eq.s32.totalorder %s379_s29, 0 }
   0xb   : > { %p393_p2 = scmp.eq.s32.totalorder %s3155_s25, 1  ;;  %p398_p3 = scmp.ne.s32.totalorder %s3037_s22, %s3033_s21 }
   0xc   : > { %p399_p4 = scmp.eq.s32.totalorder %s2412_s26, 1  ;;  %p2415_p7 = scmp.ge.s32.totalorder %s3045_s24, 1 }
   0xd   : > { %s3170_s30 = scalar_select %p380_p1, %s3041_s23, %s382_s28  }
   0xe   : > { %p3172_p5 = por %p393_p2, %p392_p0  ;;  %p3176_p6 = por %p399_p4, %p398_p3 }
   0xf   : > { %3724 = sst [smem:[#allocation8_spill]] %s3170_s30  ;;  %p473_p8 = scmp.lt.s32.totalorder %s3045_s24, 3 }
  0x10   : > { %s3726_s17 = scalar_select %p3176_p6, 1, 0 }
  0x11   : > { %p474_p9 = pnand %p2415_p7, %p473_p8 }
  0x12   : > { %3727 = sst [smem:[#allocation9_spill]] %s3726_s17  ;;  %p526_p10 = scmp.lt.s32.totalorder (!%p474_p9), %s3155_s25, 1 }
  0x13   : > { %477 = sbr.rel (%p474_p9) target bundleno = 3576 (0xdf8), region = 84  ;;  %s3728_s28 = sld [smem:[#allocation10_spill]] (!%p474_p9) }
  0x14   : > { %s3730_s1 = sld [smem:[#allocation11_spill]] (!%p474_p9) }
  0x18   : > { %s3184_s18 = scalar_select %p526_p10, %s3155_s25, 1  ;;  %vm541_vm0 = vcmask 261120   ;;  %v3047_v2 = vmov 32.0   ;;  %v2799_v14 = vld [vmem:[%s3700_s4 + $0x8] sm:$0xff]  ;;  %v2801_v15 = vld [vmem:[%s3700_s4 + $0x18] sm:$0xff]  ;;  %v2798_v18 = vld [vmem:[%s3700_s4] sm:$0xff] }
  0x19   : > { %2939 = vrcp.f32 %v3047_v2  ;;  %v2803_v16 = vld [vmem:[%s3700_s4 + $0x28] sm:$0xff]  ;;  %v2805_v17 = vld [vmem:[%s3700_s4 + $0x38] sm:$0xff]  ;;  %697 = vmatpush.bf16.msra.mxu0 %v2799_v14  ;;  %722 = vmatpush.bf16.msra.mxu1 %v2801_v15  ;;  %v2800_v19 = vld [vmem:[%s3700_s4 + $0x10] sm:$0xff]  ;;  %vm991_vm5 = vcmask 64512   ;;  %vm1119_vm6 = vcmask 1043456   ;;  %vm1397_vm11 = vcmask 523264  }
  0x1a   : > { %s3713_s19 = sshll.u32 %s3184_s18, 3  ;;  %747 = vmatpush.bf16.msra.mxu2 %v2803_v16  ;;  %772 = vmatpush.bf16.msra.mxu3 %v2805_v17  ;;  %v2802_v20 = vld [vmem:[%s3700_s4 + $0x20] sm:$0xff]  ;;  %v2804_v21 = vld [vmem:[%s3700_s4 + $0x30] sm:$0xff]  ;;  %v2807_v23 = vld [vmem:[%s3700_s4 + $0x48] sm:$0xff]  ;;  %s3729_s23 = sshll.u32 %s3184_s18, 3 }
  0x1b   : > { %s529_s29 = scalar_lea.vmem %s3728_s28, %s3713_s19  ;;  %v2809_v24 = vld [vmem:[%s3700_s4 + $0x58] sm:$0xff]  ;;  %v2811_v25 = vld [vmem:[%s3700_s4 + $0x68] sm:$0xff]  ;;  %v2806_v28 = vld [vmem:[%s3700_s4 + $0x40] sm:$0xff]  ;;  %s533_s17 = scalar_lea.vmem %s3730_s1, %s3729_s23 }
  0x1c   : > { %v3192_v0 = vld [vmem:[%s529_s29] sm:$0xff]  ;;  %v2813_v27 = vld [vmem:[%s3700_s4 + $0x78] sm:$0xff]  ;;  %v2808_v29 = vld [vmem:[%s3700_s4 + $0x50] sm:$0xff]  ;;  %s523_s29 = sand.u32 1, %s3037_s22   ;;  %s2795_s19 = sshll.u32 %s3155_s25, 3 }
  0x1d   : > { %v542_v1 = vsel %vm541_vm0, %v3192_v0, 0.0  ;;  %698 = vmatpush.bf16.msra.mxu0 %v2798_v18  ;;  %723 = vmatpush.bf16.msra.mxu1 %v2800_v19  ;;  %v2810_v31 = vld [vmem:[%s3700_s4 + $0x60] sm:$0xff]  ;;  %v2812_v32 = vld [vmem:[%s3700_s4 + $0x70] sm:$0xff]  ;;  %v2815_v46 = vld [vmem:[%s3700_s4 + $0x88] sm:$0xff]  ;;  %s2416_s30 = sshll.u32 %s523_s29, 3  ;;  %s2336_s18 = scalar_lea.hbm %s3712_s16, %s2795_s19 }
  0x1e   : > { %543 = vadd.xlane.f32.xlu0 %v542_v1  ;;  %748 = vmatpush.bf16.msra.mxu2 %v2802_v20  ;;  %v2899_v39 = vld [vmem:[%s3698_s2] ss:$0 sm:$0xff]  ;;  %v2817_v47 = vld [vmem:[%s3700_s4 + $0x98] sm:$0xff]  ;;  %v2819_v48 = vld [vmem:[%s3700_s4 + $0xa8] sm:$0xff]  ;;  %s525_s28 = scalar_lea.vmem [#allocation2], %s2416_s30  ;;  %s2340_s1 = sshll.u32 %s2336_s18, 4  ;;  %s2341_s1 = int_to_ptr.hbm [resolvable:$true] %s2340_s1 }
  0x1f   : > { %v2940_v3 = vpop.eup %2939  ;;  %773 = vmatpush.bf16.msra.mxu3 %v2804_v21  ;;  %v2900_v41 = vld [vmem:[%s3699_s3] ss:$0 sm:$0xff]  ;;  %v2821_v49 = vld [vmem:[%s3700_s4 + $0xb8] sm:$0xff]  ;;  %v2816_v51 = vld [vmem:[%s3700_s4 + $0x90] sm:$0xff]  ;;  %s2338_s25 = sshll.u32 %s525_s28, 4  ;;  %s2326_s23 = scalar_lea.sflag [#allocation3], %s523_s29  ;;  %s2339_s25 = int_to_ptr.vmem [resolvable:$true] %s2338_s25 }
  0x20   : > { %v546_v4 = vmul.f32 32.0, %v2940_v3  ;;  %vm550_vm1 = vweird.f32 %v2940_v3  ;;  %v2814_v50 = vld [vmem:[%s3700_s4 + $0x80] sm:$0xff]  ;;  %v2820_v53 = vld [vmem:[%s3700_s4 + $0xb0] sm:$0xff]  ;;  %s2997_s21 = sshra.s32 %s2341_s1, 4  ;;  %s3003_s30 = scalar_lea.hbm %s3712_s16, 16  ;;  %s2998_s21 = int_to_ptr.hbm [resolvable:$true] %s2997_s21 }
  0x21   : > { %797 = vmatpush.bf16.msrb.mxu0 %v2807_v23  ;;  %822 = vmatpush.bf16.msrb.mxu1 %v2809_v24  ;;  %v2818_v52 = vld [vmem:[%s3700_s4 + $0xa0] sm:$0xff]  ;;  %s2999_s19 = scalar_lea.hbm %s2998_s21, 8  ;;  %p3004_p0 = scmp.lt.s32.totalorder %s2998_s21, %s3712_s16 }
  0x22   : > { %v547_v5 = vsub.f32 1.0, %v546_v4  ;;  %847 = vmatpush.bf16.msrb.mxu2 %v2811_v25  ;;  %v2905_v60 = vld [vmem:[%s3701_s5 + $0x4] ss:$0 sm:$0xff]  ;;  %v2906_v61 = vld [vmem:[%s3701_s5 + $0x5] ss:$0 sm:$0xff]  ;;  %p3000_p11 = scmp.ne.s32.totalorder %s2998_s21, %s2999_s19  ;;  %p3005_p1 = scmp.lt.s32.totalorder %s3003_s30, %s2999_s19 }
  0x23   : > { %872 = vmatpush.bf16.msrb.mxu3 %v2813_v27  ;;  %v2904_v23 = vld [vmem:[%s3701_s5 + $0x3] ss:$0 sm:$0xff] }
  0x24   : > { %v548_v6 = vmul.f32 %v2940_v3, %v547_v5  ;;  %v2901_v5 = vld [vmem:[%s3701_s5] ss:$0 sm:$0xff]  ;;  %p3001_p12 = pnand %p3000_p11, %p3172_p5  ;;  %p3006_p2 = por %p3005_p1, %p3004_p0 }
  0x25   : > { %798 = vmatpush.bf16.msrb.mxu0 %v2806_v28  ;;  %823 = vmatpush.bf16.msrb.mxu1 %v2808_v29 }
  0x26   : > { %v549_v7 = vadd.f32 %v2940_v3, %v548_v6  ;;  %848 = vmatpush.bf16.msrb.mxu2 %v2810_v31  ;;  %v2910_v31 = vld [vmem:[%s3701_s5 + $0x9] ss:$0 sm:$0xff]  ;;  %p3002_p13 = pneg %p3001_p12 }
  0x27   : > { %873 = vmatpush.bf16.msrb.mxu3 %v2812_v32 }
  0x28   : > { %v3196_v8 = vsel %vm550_vm1, %v2940_v3, %v549_v7  ;;  %p3007_p3 = pnand %p3006_p2, %p3002_p13 }
  0x91   : > { %v544_v9 = vpop.xlane.xlu0 %543 }
  0x92   : > { %v552_v10 = vmul.f32 %v3196_v8, %v544_v9  ;;  %v2902_v9 = vld [vmem:[%s3701_s5 + $0x1] ss:$0 sm:$0xff] }
  0x94   : > { %v553_v11 = vsub.f32 %v3192_v0, %v552_v10  ;;  %v2907_v10 = vld [vmem:[%s3701_s5 + $0x6] ss:$0 sm:$0xff] }
  0x96   : > { %v554_v12 = vmul.f32 %v553_v11, %v553_v11 }
  0x98   : > { %v555_v13 = vsel %vm541_vm0, %v554_v12, 0.0 }
  0x99   : > { %556 = vadd.xlane.f32.xlu0 %v555_v13 }
 0x10c   : > { %v557_v22 = vpop.xlane.xlu0 %556 }
 0x10d   : > { %v558_v26 = vmul.f32 %v557_v22, %v3196_v8  ;;  %v2903_v22 = vld [vmem:[%s3701_s5 + $0x2] ss:$0 sm:$0xff] }
 0x10f   : > { %v559_v30 = vadd.f32 1e-05, %v558_v26 }
 0x111   : > { %2941 = vrsqrt.f32 %v559_v30  ;;  %vm566_vm3 = vweird.f32 %v559_v30 }
 0x117   : > { %v2942_v33 = vpop.eup %2941 }
 0x118   : > { %v561_v34 = vmul.f32 %v2942_v33, %v559_v30  ;;  %vm567_vm2 = vweird.f32 %v2942_v33  ;;  %v2909_v30 = vld [vmem:[%s3701_s5 + $0x8] ss:$0 sm:$0xff] }
 0x119   : > { %vm568_vm4 = vmor %vm566_vm3, %vm567_vm2 }
 0x11a   : > { %v562_v35 = vmul.f32 %v2942_v33, %v561_v34 }
 0x11c   : > { %v563_v36 = vmul.f32 0.5, %v562_v35 }
 0x11e   : > { %v564_v37 = vsub.f32 1.5, %v563_v36 }
 0x120   : > { %v565_v38 = vmul.f32 %v2942_v33, %v564_v37 }
 0x122   : > { %v569_v40 = vsel %vm568_vm4, %v2942_v33, %v565_v38 }
 0x123   : > { %v570_v42 = vmul.f32 %v569_v40, %v553_v11  ;;  %v2908_v11 = vld [vmem:[%s3701_s5 + $0x7] ss:$0 sm:$0xff] }
 0x125   : > { %v574_v43 = vmul.f32 %v2899_v39, %v570_v42 }
 0x127   : > { %v578_v44 = vadd.f32 %v2900_v41, %v574_v43 }
 0x129   : > { %v579_v45 = vpack.c.bf16 %v578_v44, %v578_v44  ;;  %v2911_v44 = vld [vmem:[%s3701_s5 + $0xa] ss:$0 sm:$0xff] }
 0x12b   : > { %2427 = vmatmul.msk.bf16.vlgmr.msra.gmra.mxu0 %vm541_vm0, %v579_v45  ;;  %2436 = vmatmul.msk.bf16.vlgmr.msra.gmra.mxu1 %vm541_vm0, %v579_v45 }
 0x12c   : > { %2445 = vmatmul.msk.bf16.vlgmr.msra.gmra.mxu2 %vm541_vm0, %v579_v45  ;;  %2454 = vmatmul.msk.bf16.vlgmr.msra.gmra.mxu3 %vm541_vm0, %v579_v45 }
 0x12d   : > { %897 = vmatpush.bf16.msra.mxu0 %v2815_v46  ;;  %922 = vmatpush.bf16.msra.mxu1 %v2817_v47 }
 0x12e   : > { %947 = vmatpush.bf16.msra.mxu2 %v2819_v48  ;;  %972 = vmatpush.bf16.msra.mxu3 %v2821_v49 }
 0x131   : > { %898 = vmatpush.bf16.msra.mxu0 %v2814_v50  ;;  %923 = vmatpush.bf16.msra.mxu1 %v2816_v51 }
 0x132   : > { %948 = vmatpush.bf16.msra.mxu2 %v2818_v52  ;;  %973 = vmatpush.bf16.msra.mxu3 %v2820_v53 }
 0x13b   : > { %2463 = vmatmul.msk.bf16.vlgmr.msrb.gmra.mxu0 %vm541_vm0, %v579_v45  ;;  %2472 = vmatmul.msk.bf16.vlgmr.msrb.gmra.mxu1 %vm541_vm0, %v579_v45 }
 0x13c   : > { %2481 = vmatmul.msk.bf16.vlgmr.msrb.gmra.mxu2 %vm541_vm0, %v579_v45  ;;  %2490 = vmatmul.msk.bf16.vlgmr.msrb.gmra.mxu3 %vm541_vm0, %v579_v45 }
 0x14b   : > { %2499 = vmatmul.msk.bf16.vlgmr.msra.gmra.mxu0 %vm541_vm0, %v579_v45  ;;  %2508 = vmatmul.msk.bf16.vlgmr.msra.gmra.mxu1 %vm541_vm0, %v579_v45 }
 0x14c   : > { %2517 = vmatmul.msk.bf16.vlgmr.msra.gmra.mxu2 %vm541_vm0, %v579_v45  ;;  %2526 = vmatmul.msk.bf16.vlgmr.msra.gmra.mxu3 %vm541_vm0, %v579_v45  ;;  %v2912_v45 = vld [vmem:[%s3701_s5 + $0xb] ss:$0 sm:$0xff] }
 0x1a8   : > { %v700_v54 = vpop.f32.mrf.mxu0  ;;  %v725_v55 = vpop.f32.mrf.mxu1 }
 0x1a9   : > { %v701_v16 = vadd.f32 %v2901_v5, %v700_v54  ;;  %v726_v17 = vadd.f32 %v2902_v9, %v725_v55 }
 0x1ab   : > { %v979_v26 = vpack.c.bf16 %v701_v16, %v701_v16  ;;  %v980_v27 = vpack.c.bf16 %v726_v17, %v726_v17 }
 0x1af   : > { %v750_v56 = vpop.f32.mrf.mxu2  ;;  %v775_v57 = vpop.f32.mrf.mxu3 }
 0x1b0   : > { %v702_v58 = vpop.f32.mrf.mxu0  ;;  %v727_v59 = vpop.f32.mrf.mxu1  ;;  %v751_v32 = vadd.f32 %v2903_v22, %v750_v56  ;;  %v776_v33 = vadd.f32 %v2904_v23, %v775_v57 }
 0x1b2   : > { %v981_v40 = vpack.c.bf16 %v751_v32, %v751_v32  ;;  %v982_v41 = vpack.c.bf16 %v776_v33, %v776_v33 }
 0x1b7   : > { %v752_v62 = vpop.f32.mrf.mxu2  ;;  %v777_v63 = vpop.f32.mrf.mxu3 }
 0x1b8   : > { %v800_v1 = vpop.f32.mrf.mxu0  ;;  %v825_v2 = vpop.f32.mrf.mxu1 }
 0x1b9   : > { %v801_v3 = vadd.f32 %v2905_v60, %v800_v1  ;;  %v826_v4 = vadd.f32 %v2906_v61, %v825_v2  ;;  %v536_v60 = vld [vmem:[%s533_s17] sm:$0xff]  ;;  %v3048_v61 = vmov 0.0  }
 0x1ba   : > { %vm537_vm7 = vcmp.eq.f32.partialorder %v536_v60, 0.0 }
 0x1bb   : > { %v983_v6 = vpack.c.bf16 %v801_v3, %v801_v3  ;;  %v984_v7 = vpack.c.bf16 %v826_v4, %v826_v4  ;;  %v3345_v62 = vsel %vm537_vm7, -1e+09, %v3048_v61 }
 0x1bd   : > { %v996_v12 = vsel %vm991_vm5, %v983_v6, 0  ;;  %v1015_v13 = vsel %vm991_vm5, %v984_v7, 0 }
 0x1be   : > { %1005 = vmatpush.bf16.xpose.msrb.mxu0 %v996_v12  ;;  %1024 = vmatpush.bf16.xpose.msrb.mxu1 %v1015_v13 }
 0x1bf   : > { %v850_v14 = vpop.f32.mrf.mxu2  ;;  %v875_v15 = vpop.f32.mrf.mxu3 }
 0x1c0   : > { %v851_v18 = vadd.f32 %v2907_v10, %v850_v14  ;;  %v876_v19 = vadd.f32 %v2908_v11, %v875_v15  ;;  %v802_v20 = vpop.f32.mrf.mxu0  ;;  %v827_v21 = vpop.f32.mrf.mxu1 }
 0x1c2   : > { %v985_v24 = vpack.c.bf16 %v851_v18, %v851_v18  ;;  %v986_v25 = vpack.c.bf16 %v876_v19, %v876_v19 }
 0x1c4   : > { %v1034_v28 = vsel %vm991_vm5, %v985_v24, 0  ;;  %v1053_v29 = vsel %vm991_vm5, %v986_v25, 0 }
 0x1c5   : > { %1043 = vmatpush.bf16.xpose.msrb.mxu2 %v1034_v28  ;;  %1062 = vmatpush.bf16.xpose.msrb.mxu3 %v1053_v29 }
 0x1c6   : > { %2527 = vmatmul.msk.bf16.vlgmr.msrb.gmra.mxu0 %vm991_vm5, %v979_v26  ;;  %2528 = vmatmul.msk.bf16.vlgmr.msrb.gmra.mxu1 %vm991_vm5, %v980_v27 }
 0x1c7   : > { %v852_v34 = vpop.f32.mrf.mxu2  ;;  %v877_v35 = vpop.f32.mrf.mxu3 }
 0x1c8   : > { %v900_v36 = vpop.f32.mrf.mxu0  ;;  %v925_v37 = vpop.f32.mrf.mxu1 }
 0x1c9   : > { %v901_v38 = vadd.f32 %v2909_v30, %v900_v36  ;;  %v926_v39 = vadd.f32 %v2910_v31, %v925_v37 }
 0x1cb   : > { %v987_v42 = vpack.c.bf16 %v901_v38, %v901_v38  ;;  %v988_v43 = vpack.c.bf16 %v926_v39, %v926_v39 }
 0x1cc   : > { %2529 = vmatmul.msk.bf16.vlgmr.msrb.gmra.mxu2 %vm991_vm5, %v981_v40  ;;  %2530 = vmatmul.msk.bf16.vlgmr.msrb.gmra.mxu3 %vm991_vm5, %v982_v41 }
 0x1cd   : > { %v1121_v46 = vsel %vm1119_vm6, %v987_v42, 0  ;;  %v1140_v47 = vsel %vm1119_vm6, %v988_v43, 0 }
 0x1ce   : > { %1130 = vmatpush.bf16.msra.mxu0 %v1121_v46  ;;  %1149 = vmatpush.bf16.msra.mxu1 %v1140_v47 }
 0x1cf   : > { %v950_v48 = vpop.f32.mrf.mxu2  ;;  %v975_v49 = vpop.f32.mrf.mxu3 }
 0x1d0   : > { %v951_v50 = vadd.f32 %v2911_v44, %v950_v48  ;;  %v976_v51 = vadd.f32 %v2912_v45, %v975_v49  ;;  %v902_v52 = vpop.f32.mrf.mxu0  ;;  %v927_v53 = vpop.f32.mrf.mxu1 }
 0x1d1   : > { %v1197_v53 = vld [vmem:[%s3702_s6] sm:$0xf] }
 0x1d2   : > { %v989_v54 = vpack.c.bf16 %v951_v50, %v951_v50  ;;  %v990_v55 = vpack.c.bf16 %v976_v51, %v976_v51 }
 0x1d4   : > { %v1159_v56 = vsel %vm1119_vm6, %v989_v54, 0  ;;  %v1178_v57 = vsel %vm1119_vm6, %v990_v55, 0  ;;  %v1205_v54 = vsel %vm1119_vm6, %v1197_v53, 0  ;;  %v1199_v55 = vld [vmem:[%s3702_s6 + $0x8] sm:$0xf] }
 0x1d5   : > { %1168 = vmatpush.bf16.msra.mxu2 %v1159_v56  ;;  %1187 = vmatpush.bf16.msra.mxu3 %v1178_v57  ;;  %v1243_v56 = vsel %vm1119_vm6, %v1199_v55, 0  ;;  %v1198_v57 = vld [vmem:[%s3702_s6 + $0x4] sm:$0xf]  ;;  %v2825_v55 = vld [vmem:[%s3708_s12 + $0x8] sm:$0xff] }
 0x1d6   : > { %1214 = vmatpush.bf16.msrb.mxu0 %v1205_v54 }
 0x1d7   : > { %v952_v58 = vpop.f32.mrf.mxu2  ;;  %v977_v59 = vpop.f32.mrf.mxu3 }
 0x1d8   : > { %v1224_v58 = vsel %vm1119_vm6, %v1198_v57, 0  ;;  %v1200_v59 = vld [vmem:[%s3702_s6 + $0xc] sm:$0xf]  ;;  %v2916_v57 = vld [vmem:[%s3707_s11] ss:$0 sm:$0xff] }
 0x1d9   : > { %1252 = vmatpush.bf16.msrb.mxu2 %v1243_v56  ;;  %1233 = vmatpush.bf16.msrb.mxu1 %v1224_v58  ;;  %v1262_v60 = vsel %vm1119_vm6, %v1200_v59, 0  ;;  %v2824_v56 = vld [vmem:[%s3708_s12] sm:$0xff] }
 0x1da   : > { %1271 = vmatpush.bf16.msrb.mxu3 %v1262_v60 }
 0x243   : > { %v1007_v63 = vpop.f32.mrf.mxu0  ;;  %v1026_v1 = vpop.f32.mrf.mxu1 }
 0x244   : > { %v1008_v2 = vadd.f32 %v1007_v63, %v3345_v62  ;;  %v1027_v4 = vadd.f32 %v1026_v1, %v3345_v62 }
 0x246   : > { %v1068_v3 = vsel %vm991_vm5, %v1008_v2, -inf  ;;  %v1071_v7 = vsel %vm991_vm5, %v1027_v4, -inf }
 0x247   : > { %1069 = vmax.xlane.f32.xlu2 %v1068_v3 }
 0x24b   : > { %v1009_v5 = vpop.f32.mrf.mxu0  ;;  %v1028_v6 = vpop.f32.mrf.mxu1 }
 0x24f   : > { %v1045_v9 = vpop.f32.mrf.mxu2  ;;  %v1064_v10 = vpop.f32.mrf.mxu3  ;;  %1072 = vmax.xlane.f32.xlu2 %v1071_v7 }
 0x250   : > { %v1046_v11 = vadd.f32 %v1045_v9, %v3345_v62  ;;  %v1065_v13 = vadd.f32 %v1064_v10, %v3345_v62 }
 0x252   : > { %v1074_v12 = vsel %vm991_vm5, %v1046_v11, -inf  ;;  %v1077_v16 = vsel %vm991_vm5, %v1065_v13, -inf }
 0x253   : > { %1075 = vmax.xlane.f32.xlu1 %v1074_v12 }
 0x257   : > { %v1047_v14 = vpop.f32.mrf.mxu2  ;;  %v1066_v15 = vpop.f32.mrf.mxu3 }
 0x25b   : > { %1078 = vmax.xlane.f32.xlu1 %v1077_v16 }
 0x2ba   : > { %v1070_v17 = vpop.xlane.xlu2 %1069 }
 0x2bb   : > { %v1080_v18 = vsub.f32 %v1008_v2, %v1070_v17 }
 0x2bd   : > { %v1084_v19 = vmul.f32 1.442695, %v1080_v18 }
 0x2bf   : > { %2943 = vpow2.f32 %v1084_v19 }
 0x2c2   : > { %v1073_v21 = vpop.xlane.xlu2 %1072 }
 0x2c3   : > { %v1081_v25 = vsub.f32 %v1027_v4, %v1073_v21 }
 0x2c5   : > { %v2944_v20 = vpop.eup %2943  ;;  %v1086_v27 = vmul.f32 1.442695, %v1081_v25 }
 0x2c6   : > { %v1076_v22 = vpop.xlane.xlu1 %1075  ;;  %v1092_v23 = vsel %vm991_vm5, %v2944_v20, 0.0 }
 0x2c7   : > { %v1082_v24 = vsub.f32 %v1046_v11, %v1076_v22  ;;  %1093 = vadd.xlane.f32.xlu2 %v1092_v23 }
 0x2c9   : > { %v1088_v26 = vmul.f32 1.442695, %v1082_v24 }
 0x2cb   : > { %2945 = vpow2.f32 %v1088_v26  ;;  %v2913_v26 = vld [vmem:[%s3703_s7] ss:$0 sm:$0xff] }
 0x2cc   : > { %2947 = vpow2.f32 %v1086_v27 }
 0x2ce   : > { %v1079_v28 = vpop.xlane.xlu1 %1078 }
 0x2cf   : > { %v1083_v29 = vsub.f32 %v1065_v13, %v1079_v28 }
 0x2d1   : > { %v2946_v30 = vpop.eup %2945  ;;  %v1090_v31 = vmul.f32 1.442695, %v1083_v29 }
 0x2d2   : > { %v1098_v32 = vsel %vm991_vm5, %v2946_v30, 0.0  ;;  %v2948_v33 = vpop.eup %2947 }
 0x2d3   : > { %2949 = vpow2.f32 %v1090_v31  ;;  %1099 = vadd.xlane.f32.xlu0 %v1098_v32  ;;  %v1095_v36 = vsel %vm991_vm5, %v2948_v33, 0.0 }
 0x2d9   : > { %v2950_v34 = vpop.eup %2949 }
 0x2da   : > { %v1101_v35 = vsel %vm991_vm5, %v2950_v34, 0.0 }
 0x2db   : > { %1102 = vadd.xlane.f32.xlu1 %v1101_v35  ;;  %1096 = vadd.xlane.f32.xlu0 %v1095_v36  ;;  %v2823_v36 = vld [vmem:[%s3706_s10 + $0x8] sm:$0xff] }
 0x33a   : > { %v1094_v37 = vpop.xlane.xlu2 %1093 }
 0x33b   : > { %2951 = vrcp.f32 %v1094_v37  ;;  %v2827_v37 = vld [vmem:[%s3708_s12 + $0x18] sm:$0xff] }
 0x341   : > { %v2952_v38 = vpop.eup %2951 }
 0x342   : > { %v1108_v39 = vmul.f32 %v2952_v38, %v2944_v20 }
 0x344   : > { %v1112_v40 = vpack.c.bf16 %v1108_v39, %v1108_v39 }
 0x346   : > { %v1100_v41 = vpop.xlane.xlu0 %1099  ;;  %2531 = vmatmul.msk.bf16.vlgmr.msra.gmra.mxu0 %vm991_vm5, %v1112_v40  ;;  %v2826_v40 = vld [vmem:[%s3708_s12 + $0x10] sm:$0xff] }
 0x347   : > { %2953 = vrcp.f32 %v1100_v41  ;;  %1352 = vmatpush.bf16.msra.mxu0 %v2823_v36 }
 0x34d   : > { %v2954_v42 = vpop.eup %2953 }
 0x34e   : > { %v1110_v43 = vmul.f32 %v2954_v42, %v2946_v30  ;;  %v1103_v44 = vpop.xlane.xlu1 %1102  ;;  %v1097_v45 = vpop.xlane.xlu0 %1096 }
 0x34f   : > { %2955 = vrcp.f32 %v1103_v44 }
 0x350   : > { %v1114_v46 = vpack.c.bf16 %v1110_v43, %v1110_v43  ;;  %2957 = vrcp.f32 %v1097_v45 }
 0x352   : > { %2533 = vmatmul.msk.bf16.vlgmr.msra.gmra.mxu2 %vm991_vm5, %v1114_v46 }
 0x355   : > { %v2956_v47 = vpop.eup %2955 }
 0x356   : > { %v2958_v48 = vpop.eup %2957  ;;  %v1111_v49 = vmul.f32 %v2956_v47, %v2950_v34 }
 0x357   : > { %v1109_v50 = vmul.f32 %v2958_v48, %v2948_v33  ;;  %v2914_v48 = vld [vmem:[%s3704_s8] ss:$0 sm:$0xff] }
 0x358   : > { %v1115_v51 = vpack.c.bf16 %v1111_v49, %v1111_v49 }
 0x359   : > { %v1113_v52 = vpack.c.bf16 %v1109_v50, %v1109_v50 }
 0x35a   : > { %2534 = vmatmul.msk.bf16.vlgmr.msra.gmra.mxu3 %vm991_vm5, %v1115_v51  ;;  %v2915_v51 = vld [vmem:[%s3705_s9] ss:$0 sm:$0xff] }
 0x35b   : > { %2532 = vmatmul.msk.bf16.vlgmr.msra.gmra.mxu1 %vm991_vm5, %v1113_v52 }
 0x35c   : > { %1405 = vmatpush.bf16.msra.mxu1 %v2827_v37  ;;  %v2918_v37 = vld [vmem:[%s3698_s2 + $0x1] ss:$0 sm:$0xff] }
 0x360   : > { %1406 = vmatpush.bf16.msra.mxu1 %v2826_v40 }
 0x364   : > { %1407 = vmatpush.bf16.msra.mxu1 %v2825_v55 }
 0x368   : > { %1408 = vmatpush.bf16.msra.mxu1 %v2824_v56 }
 0x3c3   : > { %v1132_v61 = vpop.f32.mrf.mxu0 }
 0x3c4   : > { %v1193_v63 = vpack.c.bf16 %v1132_v61, %v1132_v61 }
 0x3c6   : > { %2535 = vmatmul.msk.bf16.vlgmr.msrb.gmra.mxu0 %vm991_vm5, %v1193_v63 }
 0x3cb   : > { %v1134_v1 = vpop.f32.mrf.mxu0 }
 0x3cc   : > { %v2917_v1 = vld [vmem:[%s3709_s13] ss:$0 sm:$0xff] }
 0x3d5   : > { %v1170_v2 = vpop.f32.mrf.mxu2 }
 0x3d6   : > { %v1195_v3 = vpack.c.bf16 %v1170_v2, %v1170_v2 }
 0x3d8   : > { %v1151_v4 = vpop.f32.mrf.mxu1  ;;  %2537 = vmatmul.msk.bf16.vlgmr.msrb.gmra.mxu2 %vm991_vm5, %v1195_v3 }
 0x3d9   : > { %v1194_v5 = vpack.c.bf16 %v1151_v4, %v1151_v4 }
 0x3db   : > { %2536 = vmatmul.msk.bf16.vlgmr.msrb.gmra.mxu1 %vm991_vm5, %v1194_v5 }
 0x3dd   : > { %v1172_v6 = vpop.f32.mrf.mxu2  ;;  %v1189_v7 = vpop.f32.mrf.mxu3 }
 0x3de   : > { %v1196_v9 = vpack.c.bf16 %v1189_v7, %v1189_v7 }
 0x3e0   : > { %v1153_v10 = vpop.f32.mrf.mxu1  ;;  %2538 = vmatmul.msk.bf16.vlgmr.msrb.gmra.mxu3 %vm991_vm5, %v1196_v9 }
 0x3e5   : > { %v1191_v11 = vpop.f32.mrf.mxu3 }
 0x443   : > { %v1216_v12 = vpop.f32.mrf.mxu0 }
 0x444   : > { %v1277_v17 = vsel %vm541_vm0, %v1216_v12, 0.0 }
 0x44b   : > { %v1218_v13 = vpop.f32.mrf.mxu0 }
 0x44c   : > { %v2829_v13 = vld [vmem:[%s3700_s4 + $0xc8] sm:$0xff] }
 0x44d   : > { %1569 = vmatpush.bf16.msra.mxu2 %v2829_v13 }
 0x458   : > { %v1235_v14 = vpop.f32.mrf.mxu1 }
 0x459   : > { %v1278_v16 = vsel %vm541_vm0, %v1235_v14, 0.0  ;;  %v2831_v14 = vld [vmem:[%s3700_s4 + $0xd8] sm:$0xff] }
 0x45a   : > { %v1279_v20 = vadd.f32 %v1278_v16, %v1277_v17  ;;  %v2835_v16 = vld [vmem:[%s3700_s4 + $0xf8] sm:$0xff]  ;;  %1594 = vmatpush.bf16.msra.mxu3 %v2831_v14  ;;  %v2828_v17 = vld [vmem:[%s3700_s4 + $0xc0] sm:$0xff] }
 0x45b   : > { %v1254_v15 = vpop.f32.mrf.mxu2  ;;  %1644 = vmatpush.bf16.msrb.mxu1 %v2835_v16  ;;  %1570 = vmatpush.bf16.msra.mxu2 %v2828_v17 }
 0x45c   : > { %v1280_v18 = vsel %vm541_vm0, %v1254_v15, 0.0  ;;  %v2833_v15 = vld [vmem:[%s3700_s4 + $0xe8] sm:$0xff] }
 0x45d   : > { %v1281_v21 = vadd.f32 %v1280_v18, %v1279_v20  ;;  %v2830_v18 = vld [vmem:[%s3700_s4 + $0xd0] sm:$0xff] }
 0x45e   : > { %v2834_v20 = vld [vmem:[%s3700_s4 + $0xf0] sm:$0xff]  ;;  %1595 = vmatpush.bf16.msra.mxu3 %v2830_v18 }
 0x45f   : > { %1645 = vmatpush.bf16.msrb.mxu1 %v2834_v20  ;;  %v2922_v20 = vld [vmem:[%s3701_s5 + $0xc] ss:$0 sm:$0xff] }
 0x460   : > { %v1237_v19 = vpop.f32.mrf.mxu1 }
 0x461   : > { %v2832_v19 = vld [vmem:[%s3700_s4 + $0xe0] sm:$0xff] }
 0x463   : > { %v1256_v22 = vpop.f32.mrf.mxu2  ;;  %v1273_v23 = vpop.f32.mrf.mxu3 }
 0x464   : > { %v1282_v24 = vsel %vm541_vm0, %v1273_v23, 0.0  ;;  %v2837_v22 = vld [vmem:[%s3700_s4 + $0x108] sm:$0xff]  ;;  %v2839_v23 = vld [vmem:[%s3700_s4 + $0x118] sm:$0xff] }
 0x465   : > { %v1283_v25 = vadd.f32 %v1282_v24, %v1281_v21  ;;  %v2841_v24 = vld [vmem:[%s3700_s4 + $0x128] sm:$0xff]  ;;  %1669 = vmatpush.bf16.msrb.mxu2 %v2837_v22  ;;  %1694 = vmatpush.bf16.msrb.mxu3 %v2839_v23 }
 0x467   : > { %v1284_v27 = vadd.f32 %v1283_v25, %v3192_v0  ;;  %v2822_v0 = vld [vmem:[%s3706_s10] sm:$0xff] }
 0x468   : > { %1353 = vmatpush.bf16.msra.mxu0 %v2822_v0 }
 0x469   : > { %v1289_v28 = vadd.f32 %v2913_v26, %v1284_v27  ;;  %v2843_v26 = vld [vmem:[%s3700_s4 + $0x138] sm:$0xff]  ;;  %v2836_v27 = vld [vmem:[%s3700_s4 + $0x100] sm:$0xff] }
 0x46a   : > { %1670 = vmatpush.bf16.msrb.mxu2 %v2836_v27 }
 0x46b   : > { %v1275_v29 = vpop.f32.mrf.mxu3  ;;  %v1292_v30 = vsel %vm541_vm0, %v1289_v28, 0.0 }
 0x46c   : > { %1293 = vadd.xlane.f32.xlu1 %v1292_v30  ;;  %1619 = vmatpush.bf16.msrb.mxu0 %v2833_v15  ;;  %v2840_v30 = vld [vmem:[%s3700_s4 + $0x120] sm:$0xff] }
 0x470   : > { %1620 = vmatpush.bf16.msrb.mxu0 %v2832_v19 }
 0x4df   : > { %v1294_v31 = vpop.xlane.xlu1 %1293 }
 0x4e0   : > { %v1295_v32 = vmul.f32 %v1294_v31, %v3196_v8  ;;  %v2842_v31 = vld [vmem:[%s3700_s4 + $0x130] sm:$0xff] }
 0x4e2   : > { %v1296_v33 = vsub.f32 %v1289_v28, %v1295_v32 }
 0x4e4   : > { %v1297_v34 = vmul.f32 %v1296_v33, %v1296_v33 }
 0x4e6   : > { %v1298_v35 = vsel %vm541_vm0, %v1297_v34, 0.0 }
 0x4e7   : > { %1299 = vadd.xlane.f32.xlu2 %v1298_v35 }
 0x55a   : > { %v1300_v38 = vpop.xlane.xlu2 %1299 }
 0x55b   : > { %v1301_v39 = vmul.f32 %v1300_v38, %v3196_v8 }
 0x55d   : > { %v1302_v41 = vadd.f32 1e-05, %v1301_v39  ;;  %v2919_v39 = vld [vmem:[%s3699_s3 + $0x1] ss:$0 sm:$0xff] }
 0x55f   : > { %2959 = vrsqrt.f32 %v1302_v41  ;;  %vm1309_vm9 = vweird.f32 %v1302_v41 }
 0x565   : > { %v2960_v42 = vpop.eup %2959 }
 0x566   : > { %v1304_v43 = vmul.f32 %v2960_v42, %v1302_v41  ;;  %vm1310_vm8 = vweird.f32 %v2960_v42 }
 0x567   : > { %vm1311_vm10 = vmor %vm1309_vm9, %vm1310_vm8 }
 0x568   : > { %v1305_v44 = vmul.f32 %v2960_v42, %v1304_v43 }
 0x56a   : > { %v1306_v45 = vmul.f32 0.5, %v1305_v44  ;;  %v2845_v44 = vld [vmem:[%s3700_s4 + $0x148] sm:$0xff] }
 0x56c   : > { %v1307_v46 = vsub.f32 1.5, %v1306_v45  ;;  %v2847_v45 = vld [vmem:[%s3700_s4 + $0x158] sm:$0xff] }
 0x56e   : > { %v1308_v47 = vmul.f32 %v2960_v42, %v1307_v46  ;;  %v2849_v46 = vld [vmem:[%s3700_s4 + $0x168] sm:$0xff] }
 0x570   : > { %v1312_v49 = vsel %vm1311_vm10, %v2960_v42, %v1308_v47  ;;  %v2851_v47 = vld [vmem:[%s3700_s4 + $0x178] sm:$0xff] }
 0x571   : > { %v1313_v50 = vmul.f32 %v1312_v49, %v1296_v33  ;;  %v2846_v49 = vld [vmem:[%s3700_s4 + $0x150] sm:$0xff] }
 0x573   : > { %v1317_v52 = vmul.f32 %v2914_v48, %v1313_v50  ;;  %v2844_v48 = vld [vmem:[%s3700_s4 + $0x140] sm:$0xff] }
 0x574   : > { %v2848_v50 = vld [vmem:[%s3700_s4 + $0x160] sm:$0xff] }
 0x575   : > { %v1321_v53 = vadd.f32 %v2915_v51, %v1317_v52  ;;  %v2850_v51 = vld [vmem:[%s3700_s4 + $0x170] sm:$0xff] }
 0x577   : > { %v1322_v54 = vpack.c.bf16 %v1321_v53, %v1321_v53 }
 0x579   : > { %2547 = vmatmul.msk.bf16.vlgmr.msra.gmra.mxu0 %vm541_vm0, %v1322_v54 }
 0x57a   : > { %1719 = vmatpush.bf16.msra.mxu0 %v2841_v24 }
 0x57e   : > { %1720 = vmatpush.bf16.msra.mxu0 %v2840_v30 }
 0x5f6   : > { %v1355_v58 = vpop.f32.mrf.mxu0 }
 0x5f7   : > { %v1356_v59 = vadd.f32 %v2916_v57, %v1355_v58 }
 0x5f9   : > { %v1359_v60 = vmax.f32 %v1356_v59, 0.0 }
 0x5fb   : > { %v1360_v61 = vpack.c.bf16 %v1359_v60, %v1359_v60  ;;  %v2924_v60 = vld [vmem:[%s3701_s5 + $0x12] ss:$0 sm:$0xff] }
 0x5fd   : > { %2564 = vmatmul.msk.bf16.vlgmr.msra.gmra.mxu1 %vm1397_vm11, %v1360_v61  ;;  %v2925_v61 = vld [vmem:[%s3701_s5 + $0x13] ss:$0 sm:$0xff] }
 0x5fe   : > { %v1357_v63 = vpop.f32.mrf.mxu0  ;;  %1744 = vmatpush.bf16.msra.mxu1 %v2843_v26 }
 0x602   : > { %1745 = vmatpush.bf16.msra.mxu1 %v2842_v31 }
 0x67a   : > { %v1410_v2 = vpop.f32.mrf.mxu1 }
 0x67b   : > { %v1411_v3 = vadd.f32 %v2917_v1, %v1410_v2 }
 0x67d   : > { %v3427_v4 = vadd.f32 %v1411_v3, %v1289_v28  ;;  %v2838_v28 = vld [vmem:[%s3700_s4 + $0x110] sm:$0xff] }
 0x67e   : > { %1695 = vmatpush.bf16.msrb.mxu3 %v2838_v28 }
 0x67f   : > { %v1419_v5 = vsel %vm541_vm0, %v3427_v4, 0.0 }
 0x680   : > { %1420 = vadd.xlane.f32.xlu0 %v1419_v5  ;;  %v2926_v5 = vld [vmem:[%s3701_s5 + $0x10] ss:$0 sm:$0xff] }
 0x682   : > { %v1412_v6 = vpop.f32.mrf.mxu1 }
 0x683   : > { %v2927_v6 = vld [vmem:[%s3701_s5 + $0x11] ss:$0 sm:$0xff] }
 0x6f3   : > { %v1421_v7 = vpop.xlane.xlu0 %1420 }
 0x6f4   : > { %v1422_v9 = vmul.f32 %v1421_v7, %v3196_v8  ;;  %v2920_v7 = vld [vmem:[%s3701_s5 + $0xe] ss:$0 sm:$0xff] }
 0x6f6   : > { %v1423_v10 = vsub.f32 %v3427_v4, %v1422_v9  ;;  %v2921_v9 = vld [vmem:[%s3701_s5 + $0xf] ss:$0 sm:$0xff] }
 0x6f8   : > { %v1424_v11 = vmul.f32 %v1423_v10, %v1423_v10 }
 0x6fa   : > { %v1425_v12 = vsel %vm541_vm0, %v1424_v11, 0.0 }
 0x6fb   : > { %1426 = vadd.xlane.f32.xlu1 %v1425_v12 }
 0x76e   : > { %v1427_v21 = vpop.xlane.xlu1 %1426 }
 0x76f   : > { %v1428_v25 = vmul.f32 %v1427_v21, %v3196_v8  ;;  %v2923_v21 = vld [vmem:[%s3701_s5 + $0xd] ss:$0 sm:$0xff] }
 0x771   : > { %v1429_v29 = vadd.f32 1e-05, %v1428_v25 }
 0x773   : > { %2961 = vrsqrt.f32 %v1429_v29  ;;  %vm1436_vm13 = vweird.f32 %v1429_v29 }
 0x779   : > { %v2962_v32 = vpop.eup %2961 }
 0x77a   : > { %v1431_v33 = vmul.f32 %v2962_v32, %v1429_v29  ;;  %vm1437_vm12 = vweird.f32 %v2962_v32 }
 0x77b   : > { %vm1438_vm14 = vmor %vm1436_vm13, %vm1437_vm12 }
 0x77c   : > { %v1432_v34 = vmul.f32 %v2962_v32, %v1431_v33 }
 0x77e   : > { %v1433_v35 = vmul.f32 0.5, %v1432_v34  ;;  %v2928_v34 = vld [vmem:[%s3701_s5 + $0x16] ss:$0 sm:$0xff] }
 0x780   : > { %v1434_v36 = vsub.f32 1.5, %v1433_v35  ;;  %v2929_v35 = vld [vmem:[%s3701_s5 + $0x17] ss:$0 sm:$0xff] }
 0x782   : > { %v1435_v0 = vmul.f32 %v2962_v32, %v1434_v36 }
 0x784   : > { %v1439_v38 = vsel %vm1438_vm14, %v2962_v32, %v1435_v0 }
 0x785   : > { %v1440_v40 = vmul.f32 %v1439_v38, %v1423_v10 }
 0x787   : > { %v1444_v41 = vmul.f32 %v2918_v37, %v1440_v40 }
 0x789   : > { %v1448_v42 = vadd.f32 %v2919_v39, %v1444_v41  ;;  %v2930_v41 = vld [vmem:[%s3701_s5 + $0x14] ss:$0 sm:$0xff] }
 0x78b   : > { %v1449_v43 = vpack.c.bf16 %v1448_v42, %v1448_v42  ;;  %v2931_v42 = vld [vmem:[%s3701_s5 + $0x15] ss:$0 sm:$0xff] }
 0x78d   : > { %2635 = vmatmul.msk.bf16.vlgmr.msra.gmra.mxu2 %vm541_vm0, %v1449_v43  ;;  %2644 = vmatmul.msk.bf16.vlgmr.msra.gmra.mxu3 %vm541_vm0, %v1449_v43 }
 0x78e   : > { %2653 = vmatmul.msk.bf16.vlgmr.msrb.gmra.mxu0 %vm541_vm0, %v1449_v43  ;;  %2662 = vmatmul.msk.bf16.vlgmr.msrb.gmra.mxu1 %vm541_vm0, %v1449_v43 }
 0x78f   : > { %1769 = vmatpush.bf16.msra.mxu2 %v2845_v44  ;;  %1794 = vmatpush.bf16.msra.mxu3 %v2847_v45 }
 0x790   : > { %1819 = vmatpush.bf16.msrb.mxu0 %v2849_v46  ;;  %1844 = vmatpush.bf16.msrb.mxu1 %v2851_v47 }
 0x793   : > { %1770 = vmatpush.bf16.msra.mxu2 %v2844_v48  ;;  %1795 = vmatpush.bf16.msra.mxu3 %v2846_v49 }
 0x794   : > { %1820 = vmatpush.bf16.msrb.mxu0 %v2848_v50  ;;  %1845 = vmatpush.bf16.msrb.mxu1 %v2850_v51 }
 0x79d   : > { %2671 = vmatmul.msk.bf16.vlgmr.msrb.gmra.mxu2 %vm541_vm0, %v1449_v43  ;;  %2680 = vmatmul.msk.bf16.vlgmr.msrb.gmra.mxu3 %vm541_vm0, %v1449_v43 }
 0x79e   : > { %2689 = vmatmul.msk.bf16.vlgmr.msra.gmra.mxu0 %vm541_vm0, %v1449_v43  ;;  %2698 = vmatmul.msk.bf16.vlgmr.msra.gmra.mxu1 %vm541_vm0, %v1449_v43 }
 0x7ad   : > { %2707 = vmatmul.msk.bf16.vlgmr.msra.gmra.mxu2 %vm541_vm0, %v1449_v43  ;;  %2716 = vmatmul.msk.bf16.vlgmr.msra.gmra.mxu3 %vm541_vm0, %v1449_v43 }
 0x7ae   : > { %2725 = vmatmul.msk.bf16.vlgmr.msrb.gmra.mxu0 %vm541_vm0, %v1449_v43  ;;  %2734 = vmatmul.msk.bf16.vlgmr.msrb.gmra.mxu1 %vm541_vm0, %v1449_v43 }
 0x80b   : > { %v1622_v52 = vpop.f32.mrf.mxu0  ;;  %v1647_v53 = vpop.f32.mrf.mxu1 }
 0x80c   : > { %v1623_v18 = vadd.f32 %v2920_v7, %v1622_v52  ;;  %v1648_v19 = vadd.f32 %v2921_v9, %v1647_v53 }
 0x80e   : > { %v1853_v28 = vpack.c.bf16 %v1623_v18, %v1623_v18  ;;  %v1854_v29 = vpack.c.bf16 %v1648_v19, %v1648_v19 }
 0x810   : > { %v1572_v54 = vpop.f32.mrf.mxu2  ;;  %v1597_v55 = vpop.f32.mrf.mxu3 }
 0x811   : > { %v1573_v30 = vadd.f32 %v2922_v20, %v1572_v54  ;;  %v1598_v31 = vadd.f32 %v2923_v21, %v1597_v55 }
 0x813   : > { %v1624_v56 = vpop.f32.mrf.mxu0  ;;  %v1649_v57 = vpop.f32.mrf.mxu1  ;;  %v1851_v36 = vpack.c.bf16 %v1573_v30, %v1573_v30  ;;  %v1852_v0 = vpack.c.bf16 %v1598_v31, %v1598_v31 }
 0x818   : > { %v1574_v58 = vpop.f32.mrf.mxu2  ;;  %v1599_v59 = vpop.f32.mrf.mxu3 }
 0x81b   : > { %v1722_v63 = vpop.f32.mrf.mxu0  ;;  %v1747_v1 = vpop.f32.mrf.mxu1 }
 0x81c   : > { %v1723_v2 = vadd.f32 %v2924_v60, %v1722_v63  ;;  %v1748_v3 = vadd.f32 %v2925_v61, %v1747_v1 }
 0x81e   : > { %v1857_v10 = vpack.c.bf16 %v1723_v2, %v1723_v2  ;;  %v1858_v11 = vpack.c.bf16 %v1748_v3, %v1748_v3 }
 0x820   : > { %v1905_v12 = vsel %vm991_vm5, %v1857_v10, 0  ;;  %v1924_v13 = vsel %vm991_vm5, %v1858_v11, 0  ;;  %v1672_v14 = vpop.f32.mrf.mxu2  ;;  %v1697_v15 = vpop.f32.mrf.mxu3 }
 0x821   : > { %v1673_v16 = vadd.f32 %v2926_v5, %v1672_v14  ;;  %v1698_v17 = vadd.f32 %v2927_v6, %v1697_v15  ;;  %1914 = vmatpush.bf16.xpose.msra.mxu0 %v1905_v12  ;;  %1933 = vmatpush.bf16.xpose.msra.mxu1 %v1924_v13 }
 0x823   : > { %v1855_v22 = vpack.c.bf16 %v1673_v16, %v1673_v16  ;;  %v1856_v23 = vpack.c.bf16 %v1698_v17, %v1698_v17  ;;  %v1724_v24 = vpop.f32.mrf.mxu0  ;;  %v1749_v25 = vpop.f32.mrf.mxu1 }
 0x825   : > { %v1867_v26 = vsel %vm991_vm5, %v1855_v22, 0  ;;  %v1886_v27 = vsel %vm991_vm5, %v1856_v23, 0 }
 0x826   : > { %1876 = vmatpush.bf16.xpose.msrb.mxu2 %v1867_v26  ;;  %1895 = vmatpush.bf16.xpose.msrb.mxu3 %v1886_v27 }
 0x828   : > { %2737 = vmatmul.msk.bf16.vlgmr.msra.gmra.mxu0 %vm991_vm5, %v1853_v28  ;;  %2738 = vmatmul.msk.bf16.vlgmr.msra.gmra.mxu1 %vm991_vm5, %v1854_v29  ;;  %v1674_v32 = vpop.f32.mrf.mxu2  ;;  %v1699_v33 = vpop.f32.mrf.mxu3 }
 0x82b   : > { %v1822_v37 = vpop.f32.mrf.mxu0  ;;  %v1847_v38 = vpop.f32.mrf.mxu1 }
 0x82c   : > { %v1823_v39 = vadd.f32 %v2928_v34, %v1822_v37  ;;  %v1848_v40 = vadd.f32 %v2929_v35, %v1847_v38 }
 0x82d   : > { %2735 = vmatmul.msk.bf16.vlgmr.msrb.gmra.mxu2 %vm991_vm5, %v1851_v36  ;;  %2736 = vmatmul.msk.bf16.vlgmr.msrb.gmra.mxu3 %vm991_vm5, %v1852_v0 }
 0x82e   : > { %v1861_v43 = vpack.c.bf16 %v1823_v39, %v1823_v39  ;;  %v1862_v44 = vpack.c.bf16 %v1848_v40, %v1848_v40 }
 0x830   : > { %v2029_v45 = vsel %vm1119_vm6, %v1861_v43, 0  ;;  %v2048_v46 = vsel %vm1119_vm6, %v1862_v44, 0  ;;  %v1772_v47 = vpop.f32.mrf.mxu2  ;;  %v1797_v48 = vpop.f32.mrf.mxu3 }
 0x831   : > { %v1773_v49 = vadd.f32 %v2930_v41, %v1772_v47  ;;  %v1798_v50 = vadd.f32 %v2931_v42, %v1797_v48  ;;  %2038 = vmatpush.bf16.msrb.mxu0 %v2029_v45  ;;  %2057 = vmatpush.bf16.msrb.mxu1 %v2048_v46 }
 0x833   : > { %v1859_v51 = vpack.c.bf16 %v1773_v49, %v1773_v49  ;;  %v1860_v52 = vpack.c.bf16 %v1798_v50, %v1798_v50  ;;  %v1824_v53 = vpop.f32.mrf.mxu0  ;;  %v1849_v54 = vpop.f32.mrf.mxu1  ;;  %v2745_v49 = vld [vmem:[%s3702_s6 + $0x18] sm:$0xf] }
 0x834   : > { %v2114_v50 = vsel %vm1119_vm6, %v2745_v49, 0 }
 0x835   : > { %v1991_v55 = vsel %vm1119_vm6, %v1859_v51, 0  ;;  %v2010_v56 = vsel %vm1119_vm6, %v1860_v52, 0  ;;  %2123 = vmatpush.bf16.msra.mxu0 %v2114_v50  ;;  %v2743_v51 = vld [vmem:[%s3702_s6 + $0x10] sm:$0xf]  ;;  %v2744_v52 = vld [vmem:[%s3702_s6 + $0x14] sm:$0xf] }
 0x836   : > { %2000 = vmatpush.bf16.msra.mxu2 %v1991_v55  ;;  %2019 = vmatpush.bf16.msra.mxu3 %v2010_v56  ;;  %v2076_v53 = vsel %vm1119_vm6, %v2743_v51, 0  ;;  %v2095_v54 = vsel %vm1119_vm6, %v2744_v52, 0  ;;  %v2746_v55 = vld [vmem:[%s3702_s6 + $0x1c] sm:$0xf]  ;;  %v2855_v50 = vld [vmem:[%s3708_s12 + $0x28] sm:$0xff]  ;;  %v2854_v51 = vld [vmem:[%s3708_s12 + $0x20] sm:$0xff] }
 0x837   : > { %v2133_v56 = vsel %vm1119_vm6, %v2746_v55, 0  ;;  %v2935_v52 = vld [vmem:[%s3707_s11 + $0x1] ss:$0 sm:$0xff] }
 0x838   : > { %v1774_v57 = vpop.f32.mrf.mxu2  ;;  %v1799_v58 = vpop.f32.mrf.mxu3  ;;  %2142 = vmatpush.bf16.msra.mxu1 %v2133_v56 }
 0x83a   : > { %2085 = vmatpush.bf16.msrb.mxu2 %v2076_v53  ;;  %2104 = vmatpush.bf16.msrb.mxu3 %v2095_v54 }
 0x8a5   : > { %v1916_v59 = vpop.f32.mrf.mxu0  ;;  %v1935_v60 = vpop.f32.mrf.mxu1 }
 0x8a6   : > { %v1917_v61 = vadd.f32 %v1916_v59, %v3345_v62  ;;  %v1936_v11 = vadd.f32 %v1935_v60, %v3345_v62 }
 0x8a8   : > { %v1945_v63 = vsel %vm991_vm5, %v1917_v61, -inf  ;;  %v1948_v14 = vsel %vm991_vm5, %v1936_v11, -inf }
 0x8a9   : > { %1946 = vmax.xlane.f32.xlu1 %v1945_v63 }
 0x8ad   : > { %v1918_v1 = vpop.f32.mrf.mxu0  ;;  %v1937_v2 = vpop.f32.mrf.mxu1 }
 0x8b0   : > { %v1878_v3 = vpop.f32.mrf.mxu2  ;;  %v1897_v5 = vpop.f32.mrf.mxu3 }
 0x8b1   : > { %v1879_v6 = vadd.f32 %v1878_v3, %v3345_v62  ;;  %v1898_v7 = vadd.f32 %v1897_v5, %v3345_v62 }
 0x8b3   : > { %v1942_v9 = vsel %vm991_vm5, %v1898_v7, -inf  ;;  %v1939_v10 = vsel %vm991_vm5, %v1879_v6, -inf }
 0x8b4   : > { %1943 = vmax.xlane.f32.xlu0 %v1942_v9  ;;  %1940 = vmax.xlane.f32.xlu2 %v1939_v10 }
 0x8b8   : > { %v1880_v12 = vpop.f32.mrf.mxu2  ;;  %v1899_v13 = vpop.f32.mrf.mxu3 }
 0x8bc   : > { %1949 = vmax.xlane.f32.xlu2 %v1948_v14 }
 0x91c   : > { %v1947_v15 = vpop.xlane.xlu1 %1946 }
 0x91d   : > { %v1953_v16 = vsub.f32 %v1917_v61, %v1947_v15 }
 0x91f   : > { %v1959_v17 = vmul.f32 1.442695, %v1953_v16 }
 0x921   : > { %2963 = vpow2.f32 %v1959_v17 }
 0x927   : > { %v2964_v18 = vpop.eup %2963  ;;  %v1944_v19 = vpop.xlane.xlu0 %1943 }
 0x928   : > { %v1941_v20 = vpop.xlane.xlu2 %1940  ;;  %v1952_v21 = vsub.f32 %v1898_v7, %v1944_v19  ;;  %v1969_v23 = vsel %vm991_vm5, %v2964_v18, 0.0 }
 0x929   : > { %v1951_v22 = vsub.f32 %v1879_v6, %v1941_v20  ;;  %1970 = vadd.xlane.f32.xlu2 %v1969_v23 }
 0x92a   : > { %v1957_v24 = vmul.f32 1.442695, %v1952_v21 }
 0x92b   : > { %v1955_v25 = vmul.f32 1.442695, %v1951_v22  ;;  %v2932_v22 = vld [vmem:[%s3703_s7 + $0x1] ss:$0 sm:$0xff] }
 0x92c   : > { %2965 = vpow2.f32 %v1957_v24 }
 0x92d   : > { %2967 = vpow2.f32 %v1955_v25 }
 0x930   : > { %v1950_v62 = vpop.xlane.xlu2 %1949 }
 0x931   : > { %v1954_v26 = vsub.f32 %v1936_v11, %v1950_v62 }
 0x932   : > { %v2966_v27 = vpop.eup %2965 }
 0x933   : > { %v1961_v28 = vmul.f32 1.442695, %v1954_v26  ;;  %v2968_v29 = vpop.eup %2967  ;;  %v1966_v30 = vsel %vm991_vm5, %v2966_v27, 0.0 }
 0x934   : > { %1967 = vadd.xlane.f32.xlu1 %v1966_v30  ;;  %v1963_v31 = vsel %vm991_vm5, %v2968_v29, 0.0 }
 0x935   : > { %2969 = vpow2.f32 %v1961_v28  ;;  %1964 = vadd.xlane.f32.xlu0 %v1963_v31 }
 0x93b   : > { %v2970_v32 = vpop.eup %2969 }
 0x93c   : > { %v1972_v33 = vsel %vm991_vm5, %v2970_v32, 0.0 }
 0x93d   : > { %1973 = vadd.xlane.f32.xlu0 %v1972_v33  ;;  %v2857_v33 = vld [vmem:[%s3708_s12 + $0x38] sm:$0xff] }
 0x99c   : > { %v1971_v34 = vpop.xlane.xlu2 %1970 }
 0x99d   : > { %2971 = vrcp.f32 %v1971_v34 }
 0x9a3   : > { %v2972_v35 = vpop.eup %2971 }
 0x9a4   : > { %v1981_v36 = vmul.f32 %v2972_v35, %v2964_v18 }
 0x9a6   : > { %v1985_v0 = vpack.c.bf16 %v1981_v36, %v1981_v36  ;;  %v2856_v36 = vld [vmem:[%s3708_s12 + $0x30] sm:$0xff] }
 0x9a7   : > { %v1968_v37 = vpop.xlane.xlu1 %1967 }
 0x9a8   : > { %2973 = vrcp.f32 %v1968_v37  ;;  %v1965_v38 = vpop.xlane.xlu0 %1964  ;;  %2741 = vmatmul.msk.bf16.vlgmr.msrb.gmra.mxu0 %vm991_vm5, %v1985_v0 }
 0x9a9   : > { %2975 = vrcp.f32 %v1965_v38 }
 0x9ae   : > { %v2974_v39 = vpop.eup %2973 }
 0x9af   : > { %v2976_v40 = vpop.eup %2975  ;;  %v1980_v41 = vmul.f32 %v2974_v39, %v2966_v27 }
 0x9b0   : > { %v1979_v42 = vmul.f32 %v2976_v40, %v2968_v29  ;;  %v1974_v43 = vpop.xlane.xlu0 %1973 }
 0x9b1   : > { %v1984_v44 = vpack.c.bf16 %v1980_v41, %v1980_v41  ;;  %2977 = vrcp.f32 %v1974_v43  ;;  %v2933_v43 = vld [vmem:[%s3704_s8 + $0x1] ss:$0 sm:$0xff] }
 0x9b2   : > { %v1983_v45 = vpack.c.bf16 %v1979_v42, %v1979_v42 }
 0x9b3   : > { %2740 = vmatmul.msk.bf16.vlgmr.msra.gmra.mxu3 %vm991_vm5, %v1984_v44 }
 0x9b4   : > { %2739 = vmatmul.msk.bf16.vlgmr.msra.gmra.mxu2 %vm991_vm5, %v1983_v45  ;;  %2282 = vmatpush.bf16.msra.mxu3 %v2857_v33  ;;  %v2934_v45 = vld [vmem:[%s3705_s9 + $0x1] ss:$0 sm:$0xff] }
 0x9b7   : > { %v2978_v46 = vpop.eup %2977 }
 0x9b8   : > { %v1982_v47 = vmul.f32 %v2978_v46, %v2970_v32  ;;  %v2853_v32 = vld [vmem:[%s3706_s10 + $0x18] sm:$0xff]  ;;  %2283 = vmatpush.bf16.msra.mxu3 %v2856_v36 }
 0x9b9   : > { %2228 = vmatpush.bf16.msra.mxu2 %v2853_v32 }
 0x9ba   : > { %v1986_v48 = vpack.c.bf16 %v1982_v47, %v1982_v47 }
 0x9bc   : > { %2742 = vmatmul.msk.bf16.vlgmr.msrb.gmra.mxu1 %vm991_vm5, %v1986_v48  ;;  %2284 = vmatpush.bf16.msra.mxu3 %v2855_v50 }
 0x9c0   : > { %2285 = vmatpush.bf16.msra.mxu3 %v2854_v51 }
 0xa25   : > { %v2040_v57 = vpop.f32.mrf.mxu0 }
 0xa26   : > { %v2065_v58 = vpack.c.bf16 %v2040_v57, %v2040_v57 }
 0xa28   : > { %2749 = vmatmul.msk.bf16.vlgmr.msra.gmra.mxu0 %vm991_vm5, %v2065_v58  ;;  %v2936_v58 = vld [vmem:[%s3709_s13 + $0x1] ss:$0 sm:$0xff] }
 0xa2d   : > { %v2042_v59 = vpop.f32.mrf.mxu0 }
 0xa36   : > { %v2021_v60 = vpop.f32.mrf.mxu3 }
 0xa37   : > { %v2002_v61 = vpop.f32.mrf.mxu2  ;;  %v2064_v63 = vpack.c.bf16 %v2021_v60, %v2021_v60 }
 0xa38   : > { %v2063_v1 = vpack.c.bf16 %v2002_v61, %v2002_v61 }
 0xa39   : > { %v2059_v2 = vpop.f32.mrf.mxu1  ;;  %2748 = vmatmul.msk.bf16.vlgmr.msrb.gmra.mxu3 %vm991_vm5, %v2064_v63 }
 0xa3a   : > { %v2066_v3 = vpack.c.bf16 %v2059_v2, %v2059_v2  ;;  %2747 = vmatmul.msk.bf16.vlgmr.msrb.gmra.mxu2 %vm991_vm5, %v2063_v1 }
 0xa3c   : > { %2750 = vmatmul.msk.bf16.vlgmr.msra.gmra.mxu1 %vm991_vm5, %v2066_v3 }
 0xa3e   : > { %v2023_v5 = vpop.f32.mrf.mxu3 }
 0xa3f   : > { %v2004_v6 = vpop.f32.mrf.mxu2 }
 0xa41   : > { %v2061_v7 = vpop.f32.mrf.mxu1 }
 0xaa5   : > { %v2125_v9 = vpop.f32.mrf.mxu0 }
 0xaa6   : > { %v2151_v17 = vsel %vm541_vm0, %v2125_v9, 0.0 }
 0xaad   : > { %v2127_v10 = vpop.f32.mrf.mxu0 }
 0xab9   : > { %v2144_v11 = vpop.f32.mrf.mxu1 }
 0xaba   : > { %v2153_v20 = vsel %vm541_vm0, %v2144_v11, 0.0 }
 0xabc   : > { %v2106_v12 = vpop.f32.mrf.mxu3 }
 0xabd   : > { %v2087_v13 = vpop.f32.mrf.mxu2  ;;  %v2149_v14 = vsel %vm541_vm0, %v2106_v12, 0.0 }
 0xabe   : > { %v2148_v15 = vsel %vm541_vm0, %v2087_v13, 0.0 }
 0xabf   : > { %v2150_v16 = vadd.f32 %v2149_v14, %v2148_v15 }
 0xac1   : > { %v2152_v18 = vadd.f32 %v2151_v17, %v2150_v16  ;;  %v2146_v19 = vpop.f32.mrf.mxu1 }
 0xac3   : > { %v2154_v21 = vadd.f32 %v2153_v20, %v2152_v18  ;;  %v2937_v18 = vld [vmem:[%s3710_s14] ss:$0 sm:$0xff] }
 0xac4   : > { %v2108_v23 = vpop.f32.mrf.mxu3  ;;  %v2938_v20 = vld [vmem:[%s3711_s15] ss:$0 sm:$0xff] }
 0xac5   : > { %v2089_v24 = vpop.f32.mrf.mxu2  ;;  %v2155_v25 = vadd.f32 %v2154_v21, %v3427_v4  ;;  %v2852_v4 = vld [vmem:[%s3706_s10 + $0x10] sm:$0xff] }
 0xac6   : > { %2229 = vmatpush.bf16.msra.mxu2 %v2852_v4 }
 0xac7   : > { %v2161_v62 = vadd.f32 %v2932_v22, %v2155_v25 }
 0xac9   : > { %v2166_v26 = vsel %vm541_vm0, %v2161_v62, 0.0 }
 0xaca   : > { %2167 = vadd.xlane.f32.xlu1 %v2166_v26 }
 0xb3d   : > { %v2168_v27 = vpop.xlane.xlu1 %2167 }
 0xb3e   : > { %v2169_v28 = vmul.f32 %v2168_v27, %v3196_v8 }
 0xb40   : > { %v2170_v29 = vsub.f32 %v2161_v62, %v2169_v28 }
 0xb42   : > { %v2171_v30 = vmul.f32 %v2170_v29, %v2170_v29 }
 0xb44   : > { %v2172_v31 = vsel %vm541_vm0, %v2171_v30, 0.0 }
 0xb45   : > { %2173 = vadd.xlane.f32.xlu2 %v2172_v31 }
 0xbb8   : > { %v2174_v34 = vpop.xlane.xlu2 %2173 }
 0xbb9   : > { %v2175_v35 = vmul.f32 %v2174_v34, %v3196_v8 }
 0xbbb   : > { %v2176_v0 = vadd.f32 1e-05, %v2175_v35 }
 0xbbd   : > { %2979 = vrsqrt.f32 %v2176_v0  ;;  %vm2183_vm1 = vweird.f32 %v2176_v0 }
 0xbc3   : > { %v2980_v37 = vpop.eup %2979 }
 0xbc4   : > { %v2178_v38 = vmul.f32 %v2980_v37, %v2176_v0  ;;  %vm2184_vm15 = vweird.f32 %v2980_v37 }
 0xbc5   : > { %vm2185_vm2 = vmor %vm2183_vm1, %vm2184_vm15 }
 0xbc6   : > { %v2179_v39 = vmul.f32 %v2980_v37, %v2178_v38 }
 0xbc8   : > { %v2180_v40 = vmul.f32 0.5, %v2179_v39 }
 0xbca   : > { %v2181_v41 = vsub.f32 1.5, %v2180_v40 }
 0xbcc   : > { %v2182_v42 = vmul.f32 %v2980_v37, %v2181_v41 }
 0xbce   : > { %v2186_v44 = vsel %vm2185_vm2, %v2980_v37, %v2182_v42 }
 0xbcf   : > { %v2187_v46 = vmul.f32 %v2186_v44, %v2170_v29 }
 0xbd1   : > { %v2191_v47 = vmul.f32 %v2933_v43, %v2187_v46 }
 0xbd3   : > { %v2195_v48 = vadd.f32 %v2934_v45, %v2191_v47 }
 0xbd5   : > { %v2196_v49 = vpack.c.bf16 %v2195_v48, %v2195_v48 }
 0xbd7   : > { %2767 = vmatmul.msk.bf16.vlgmr.msra.gmra.mxu2 %vm541_vm0, %v2196_v49 }
 0xc5a   : > { %v2231_v53 = vpop.f32.mrf.mxu2 }
 0xc5b   : > { %v2232_v54 = vadd.f32 %v2935_v52, %v2231_v53 }
 0xc5d   : > { %v2235_v55 = vmax.f32 %v2232_v54, 0.0 }
 0xc5f   : > { %v2236_v56 = vpack.c.bf16 %v2235_v55, %v2235_v55 }
 0xc61   : > { %2793 = vmatmul.msk.bf16.vlgmr.msra.gmra.mxu3 %vm1397_vm11, %v2236_v56 }
 0xc62   : > { %v2233_v57 = vpop.f32.mrf.mxu2 }
 0xce4   : > { %v2287_v59 = vpop.f32.mrf.mxu3 }
 0xce5   : > { %v2288_v60 = vadd.f32 %v2936_v58, %v2287_v59 }
 0xce7   : > { %v2291_v61 = vadd.f32 %v2288_v60, %v2161_v62 }
 0xce9   : > { %v2294_v63 = vsel %vm541_vm0, %v2291_v61, 0.0 }
 0xcea   : > { %2295 = vadd.xlane.f32.xlu0 %v2294_v63 }
 0xcec   : > { %v2289_v1 = vpop.f32.mrf.mxu3 }
 0xd5d   : > { %v2296_v2 = vpop.xlane.xlu0 %2295 }
 0xd5e   : > { %v2297_v3 = vmul.f32 %v2296_v2, %v3196_v8 }
 0xd60   : > { %v2298_v5 = vsub.f32 %v2291_v61, %v2297_v3 }
 0xd62   : > { %v2299_v6 = vmul.f32 %v2298_v5, %v2298_v5 }
 0xd64   : > { %v2300_v7 = vsel %vm541_vm0, %v2299_v6, 0.0 }
 0xd65   : > { %2301 = vadd.xlane.f32.xlu1 %v2300_v7 }
 0xdd8   : > { %v2302_v9 = vpop.xlane.xlu1 %2301 }
 0xdd9   : > { %v2303_v10 = vmul.f32 %v2302_v9, %v3196_v8 }
 0xddb   : > { %v2304_v11 = vadd.f32 1e-05, %v2303_v10 }
 0xddd   : > { %2981 = vrsqrt.f32 %v2304_v11  ;;  %vm2311_vm4 = vweird.f32 %v2304_v11 }
 0xde3   : > { %v2982_v12 = vpop.eup %2981 }
 0xde4   : > { %v2306_v13 = vmul.f32 %v2982_v12, %v2304_v11  ;;  %vm2312_vm3 = vweird.f32 %v2982_v12 }
 0xde5   : > { %vm2313_vm5 = vmor %vm2311_vm4, %vm2312_vm3 }
 0xde6   : > { %v2307_v14 = vmul.f32 %v2982_v12, %v2306_v13 }
 0xde8   : > { %v2308_v15 = vmul.f32 0.5, %v2307_v14 }
 0xdea   : > { %v2309_v16 = vsub.f32 1.5, %v2308_v15 }
 0xdec   : > { %v2310_v17 = vmul.f32 %v2982_v12, %v2309_v16 }
 0xdee   : > { %v2314_v8 = vsel %vm2313_vm5, %v2982_v12, %v2310_v17 }
 0xdef   : > { %v2315_v19 = vmul.f32 %v2314_v8, %v2298_v5 }
 0xdf1   : > { %v2319_v21 = vmul.f32 %v2937_v18, %v2315_v19 }
 0xdf3   : > { %v2323_v22 = vadd.f32 %v2938_v20, %v2319_v21 }
 0xdf5   : > { %2324 = vst.msk [vmem:[%s525_s28] sm:$0xff] %vm541_vm0, %v2323_v22 }
 0xdf6   : > { %3010 = shalt.err (!%p3007_p3)
}
 0xdf7   : > { %2858 = dma.vmem_to_hbm [thread:$0]  (%p3172_p5), %s2339_s25, 128, %s2341_s1, %s2326_s23  }
 0xdf8 PF: > { %s3731_s29 = sld [smem:[#allocation5_spill]]  ;;  %p2864_p4 = scmp.ge.s32.totalorder %s3045_s24, 2 }
 0xdfa   : > { %p2861_p7 = pnand %p2864_p4, %p3176_p6 }
 0xdfc   : > { %p2862_p8 = pneg %p2861_p7 }
 0xdfe   : > { %s2352_s28 = sand.u32 1, %s3731_s29  }
 0xdff   : > { %s2353_s27 = scalar_lea.sflag [#allocation3], %s2352_s28 }
 0xe00   : > { %3028 = dma.done.wait (%p2862_p8), %s2353_s27, 128  }
 0xe01   : > { %3030 = vsyncadd (%p2862_p8), %s2353_s27, 4294967168  ;;  %s3733_s24 = sld [smem:[#allocation7_spill]]  ;;  %s3736_s21 = smov %s3037_s22 }
 0xe02   : > { %s3734_s19 = sld [smem:[#allocation6_spill]] }
 0xe03   : > { %s3735_s23 = sld [smem:[#allocation8_spill]] }
 0xe07   : > { %p26_p9 = scmp.ge.s32.totalorder %s3733_s24, 4  }
 0xe08   : > { %s3737_s22 = smov %s3734_s19 }
 0xe09   :  { %28 = sbr.rel (!%p26_p9) target bundleno = 6 (0x6), region = 134 }
 0xe0e   :  { %2359 = vsyncpa [#allocation3], 1 }
 0xe0f   :  { %2361 = vsyncpa [#allocation3 + $0x1], 1 }

</bundles_post_ra>
